<compile_context>
chip_gen: v5e
topology: v5e:2x2
jax: 0.10.0
libtpu: 0.0.40
codegen_flags: <defaults>
</compile_context>

<pallas_src>
import functools

import jax
import jax.numpy as jnp
from jax.experimental import pallas as pl
from jax.experimental.pallas import tpu as pltpu


# --------------------------------------------------------------------------------------
# helpers
# --------------------------------------------------------------------------------------

def _round_up(a, m):
    return ((a + m - 1) // m) * m


def _vmem_limit_bytes():
    # Per-generation scoped-VMEM budget: ~3/4 of physical (v7x 64 MiB -> 48 MiB,
    # v5e/v6e 128 MiB -> 96 MiB). Conservative fallback if the query is unavailable.
    try:
        cap = pltpu.get_tpu_info().vmem_capacity_bytes
        return max(32 << 20, min(int(cap) * 3 // 4, 100 << 20))
    except Exception:
        return 48 << 20


def _pick_pass1_rows(Ho, Wo, Wp, Cin, Cp, stride, x_isz, y_isz, budget):
    """Largest output-row block TH (divisor of Ho) whose real per-step VMEM fits budget."""
    overlap = max(3 - stride, 0)
    cands = [t for t in range(1, Ho + 1) if Ho % t == 0 and t * stride >= overlap]
    if not cands:
        raise NotImplementedError("output height too small for halo row tiling")
    best = cands[0]
    best_aligned = 0
    for th in cands:
        rows_in = th * stride
        halo = 8 if rows_in % 8 == 0 else rows_in
        in_bytes = 2 * (rows_in + halo) * Wp * Cin * x_isz        # double-buffered input
        tmp_bytes = (rows_in + 2) * Wp * Cin * x_isz \
            + 3 * th * Wo * Cin * x_isz                           # window copy + im2col taps
        w_bytes = 2 * 9 * Cin * Cp * x_isz                        # (double-buffered) weights
        out_bytes = 2 * th * Wo * Cp * y_isz                      # double-buffered output
        acc_bytes = 2 * th * Wo * Cp * 4                          # f32 acc (+ M2 temp)
        if in_bytes + tmp_bytes + w_bytes + out_bytes + acc_bytes > budget:
            continue
        if th * Wo * Cp * y_isz > (8 << 20):                      # diminishing returns
            continue
        best = th
        if rows_in % 8 == 0:
            best_aligned = th
    # Prefer an 8-row-aligned block (cheap 8-row halo DMA) unless it is much smaller.
    if best_aligned and 2 * best_aligned >= best:
        return best_aligned
    return best


def _pick_pass2_rows(Ho, Wo, Cp, y_isz, budget):
    """Largest row block for the streaming BN+LeakyReLU pass (pure HBM-bound)."""
    best = 1
    for th in range(1, Ho + 1):
        if Ho % th:
            continue
        blk = th * Wo * Cp * y_isz
        if 4 * blk <= budget and blk <= (8 << 20):                # in+out, double-buffered
            best = th
    return best


# --------------------------------------------------------------------------------------
# kernels
# --------------------------------------------------------------------------------------

def _conv_stats_kernel_factory(TH, Wo, Cin, Cp, stride, overlap, mm_dtype):
    """Pass 1: 3x3 conv (stride s) + bias for one (batch, row-block) + BN partial stats."""

    def kernel(xm_ref, xh_ref, w_ref, b_ref, y_ref, st_ref):
        # xm_ref: (TH*stride, Wp, Cin)   main input rows of this row block
        # xh_ref: (halo_rows, Wp, Cin)   halo rows (first `overlap` rows are used)
        # w_ref:  (9, Cin, Cp)           weights, tap-major
        # b_ref:  (1, Cp)                conv bias (f32)
        # y_ref:  (TH, Wo, Cp)           conv+bias output block
        # st_ref: (2, Cp)                per-block [sum, M2 about block mean]
        xm = xm_ref[...]
        if overlap > 0:
            win = jnp.concatenate([xm, xh_ref[0:overlap]], axis=0)
        else:
            win = xm
        win = win.astype(mm_dtype)

        acc = jnp.zeros((TH * Wo, Cp), jnp.float32)
        for kh in range(3):
            if stride == 1:
                rows_k = win[kh:kh + TH]                                   # (TH, Wp, Cin)
            else:
                rows_k = win[kh:kh + (TH - 1) * stride + 1:stride]         # (TH, Wp, Cin)
            if stride == 1:
                shifted = [rows_k[:, kw:kw + Wo, :] for kw in range(3)]
            elif stride == 2:
                # Hoisted column decimation: 2 strided slices per kh instead of 3.
                dec0 = rows_k[:, 0::2, :]
                dec1 = rows_k[:, 1::2, :]
                shifted = [dec0[:, :Wo, :], dec1[:, :Wo, :], dec0[:, 1:Wo + 1, :]]
            else:
                shifted = [rows_k[:, kw:kw + (Wo - 1) * stride + 1:stride, :]
                           for kw in range(3)]
            for kw in range(3):
                patch = shifted[kw].reshape(TH * Wo, Cin)
                # Per-tap MXU dot accumulated in f32 (no lane-axis im2col concat).
                acc += jnp.dot(patch, w_ref[kh * 3 + kw],
                               preferred_element_type=jnp.float32)

        acc += b_ref[...].astype(jnp.float32)                              # (TH*Wo, Cp)
        y_ref[...] = acc.reshape(TH, Wo, Cp).astype(y_ref.dtype)

        # BN partials for this block: sum and M2 about the block mean (Chan combine in
        # the wrapper). Removes cross-row-block accumulation -> both grid axes parallel.
        s1 = jnp.sum(acc, axis=0, keepdims=True)                           # (1, Cp)
        mu = s1 * (1.0 / float(TH * Wo))
        d = acc - mu
        m2 = jnp.sum(d * d, axis=0, keepdims=True)                         # (1, Cp)
        st_ref[0:1, :] = s1
        st_ref[1:2, :] = m2

    return kernel


def _bn_lrelu_kernel_factory(neg_slope):
    """Pass 2: y * scale + shift (fused BN) followed by LeakyReLU. Pure streaming."""
    def kernel(y_ref, sc_ref, sh_ref, o_ref):
        y = y_ref[...].astype(jnp.float32)                                 # (TH2, Wo, Cp)
        z = y * sc_ref[...].reshape(1, 1, -1) + sh_ref[...].reshape(1, 1, -1)
        o_ref[...] = jnp.where(z > 0, z, neg_slope * z).astype(o_ref.dtype)
    return kernel


# --------------------------------------------------------------------------------------
# wrappers
# --------------------------------------------------------------------------------------

def conv_block_nhwc(x, w_oihw, bias, gamma, beta, *, stride=1, eps=1e-5,
                    neg_slope=0.2, block_rows=None, matmul_dtype=None):
    """NHWC-in / NHWC-out ConvBlock (chained blocks can skip NCHW<->NHWC transposes)."""
    N, H, W, Cin = x.shape
    Cout = w_oihw.shape[0]
    Ho = (H + 2 - 3) // stride + 1
    Wo = (W + 2 - 3) // stride + 1
    Wp = W + 2
    overlap = max(3 - stride, 0)

    # Lane-dense padding only when overhead is small (<=25%); narrow layers keep the
    # true channel width and accept masked stores instead of inflated HBM traffic.
    Cpad = _round_up(Cout, 128)
    Cp = Cpad if (Cpad - Cout) * 4 <= Cout else Cout

    mm_dt = x.dtype if matmul_dtype is None else jnp.dtype(matmul_dtype)
    y_dtype = x.dtype
    x_isz = x.dtype.itemsize
    y_isz = jnp.dtype(y_dtype).itemsize
    vmem_limit = _vmem_limit_bytes()
    budget = int(vmem_limit * 0.6)

    if block_rows is None:
        TH = _pick_pass1_rows(Ho, Wo, Wp, Cin, Cp, stride, x_isz, y_isz, budget)
    else:
        TH = int(block_rows)
        assert Ho % TH == 0, (Ho, TH)
        assert TH * stride >= overlap, (TH, stride)
    n_rb = Ho // TH
    rows_in = TH * stride

    # Halo block: 8 rows when the main block is 8-row aligned, otherwise one extra
    # main-sized block (slightly more DMA, still correct).
    if rows_in % 8 == 0:
        halo_rows = 8
        hstep = rows_in // 8
        def halo_map(n, r):
            return (n, (r + 1) * hstep, 0, 0)
    else:
        halo_rows = rows_in
        def halo_map(n, r):
            return (n, r + 1, 0, 0)

    # Pad rows: conv halo (1 top / >=1 bottom) + enough zero rows for the last halo block,
    # rounded to a multiple of the main block so every referenced block is in-bounds.
    req_rows = max(H + 2, Ho * stride + halo_rows)
    R_pad = _round_up(req_rows, rows_in)
    xp = jnp.pad(x, ((0, 0), (1, R_pad - H - 1), (1, 1), (0, 0)))          # (N, R_pad, Wp, Cin)

    # Weights tap-major (9, Cin, Cp); bias / BN params padded & in f32.
    w = jnp.transpose(w_oihw, (2, 3, 1, 0)).reshape(9, Cin, Cout)
    w = jnp.pad(w, ((0, 0), (0, 0), (0, Cp - Cout))).astype(mm_dt)
    b = jnp.pad(bias.astype(jnp.float32).reshape(1, Cout), ((0, 0), (0, Cp - Cout)))
    gamma_p = jnp.pad(gamma.astype(jnp.float32), (0, Cp - Cout))
    beta_p = jnp.pad(beta.astype(jnp.float32), (0, Cp - Cout))

    grid = (N, n_rb)

    # ---- Pass 1: conv + bias + per-block BN partials ----------------------------------
    # TODO(synk): on v7x, single-buffer the constant weight block (pipeline_mode) and/or
    # store it in bf16 to reclaim VMEM headroom for very wide layers.
    conv_kernel = _conv_stats_kernel_factory(TH, Wo, Cin, Cp, stride, overlap, mm_dt)
    y1, stats = pl.pallas_call(
        conv_kernel,
        grid=grid,
        in_specs=[
            pl.BlockSpec((None, rows_in, Wp, Cin), lambda n, r: (n, r, 0, 0)),
            pl.BlockSpec((None, halo_rows, Wp, Cin), halo_map),
            pl.BlockSpec((9, Cin, Cp), lambda n, r: (0, 0, 0)),
            pl.BlockSpec((1, Cp), lambda n, r: (0, 0)),
        ],
        out_specs=[
            pl.BlockSpec((None, TH, Wo, Cp), lambda n, r: (n, r, 0, 0)),
            pl.BlockSpec((None, 2, Cp), lambda n, r: (n * n_rb + r, 0, 0)),
        ],
        out_shape=[
            jax.ShapeDtypeStruct((N, Ho, Wo, Cp), y_dtype),
            jax.ShapeDtypeStruct((N * n_rb, 2, Cp), jnp.float32),
        ],
        compiler_params=pltpu.CompilerParams(
            dimension_semantics=("parallel", "parallel"),
            vmem_limit_bytes=vmem_limit),
    )(xp, xp, w, b)

    # ---- Tiny per-channel math: Chan-combine partials -> fused scale / shift ----------
    # TODO(synk): nn.BatchNorm2d running_mean/running_var momentum updates (module state)
    # are not produced; only the training-mode normalization output is computed.
    cnt_b = jnp.float32(TH * Wo)
    total = jnp.float32(N * Ho * Wo)
    sums = stats[:, 0, :]                                                  # (B, Cp)
    m2s = stats[:, 1, :]                                                   # (B, Cp)
    mean = jnp.sum(sums, axis=0) / total                                   # (Cp,)
    mean_b = sums / cnt_b
    m2 = jnp.sum(m2s, axis=0) + cnt_b * jnp.sum((mean_b - mean) ** 2, axis=0)
    var = jnp.maximum(m2 / total, 0.0)                                     # biased (training)
    inv = jax.lax.rsqrt(var + eps)
    scale = (gamma_p * inv).reshape(1, Cp)
    shift = (beta_p - mean * gamma_p * inv).reshape(1, Cp)

    # ---- Pass 2: normalize + LeakyReLU (large streaming blocks, y1 aliased) -----------
    TH2 = _pick_pass2_rows(Ho, Wo, Cp, y_isz, budget)
    bn_kernel = _bn_lrelu_kernel_factory(float(neg_slope))
    out_p = pl.pallas_call(
        bn_kernel,
        grid=(N, Ho // TH2),
        in_specs=[
            pl.BlockSpec((None, TH2, Wo, Cp), lambda n, r: (n, r, 0, 0)),
            pl.BlockSpec((1, Cp), lambda n, r: (0, 0)),
            pl.BlockSpec((1, Cp), lambda n, r: (0, 0)),
        ],
        out_specs=pl.BlockSpec((None, TH2, Wo, Cp), lambda n, r: (n, r, 0, 0)),
        out_shape=jax.ShapeDtypeStruct((N, Ho, Wo, Cp), y_dtype),
        input_output_aliases={0: 0},
        compiler_params=pltpu.CompilerParams(
            dimension_semantics=("parallel", "parallel"),
            vmem_limit_bytes=vmem_limit),
    )(y1, scale, shift)

    if Cp != Cout:
        out_p = out_p[..., :Cout]
    return out_p


@functools.partial(jax.jit, static_argnames=("stride", "eps", "neg_slope",
                                              "block_rows", "matmul_dtype"))
def conv_block(x_nchw, w_oihw, bias, gamma, beta, *, stride=1, eps=1e-5,
               neg_slope=0.2, block_rows=None, matmul_dtype=None):
    """PyTorch-layout ConvBlock: Conv2d(3x3, pad=1, stride) + BatchNorm2d + LeakyReLU(0.2)."""
    x = jnp.transpose(x_nchw, (0, 2, 3, 1))                                # NCHW -> NHWC
    out = conv_block_nhwc(x, w_oihw, bias, gamma, beta, stride=stride, eps=eps,
                          neg_slope=neg_slope, block_rows=block_rows,
                          matmul_dtype=matmul_dtype)
    return jnp.transpose(out, (0, 3, 1, 2))                                # NHWC -> NCHW


# --------------------------------------------------------------------------------------
# reference + test
# --------------------------------------------------------------------------------------

def _reference(x_nchw, w_oihw, bias, gamma, beta, stride, eps=1e-5, neg_slope=0.2):
    y = jax.lax.conv_general_dilated(
        x_nchw.astype(jnp.float32), w_oihw.astype(jnp.float32),
        window_strides=(stride, stride), padding=((1, 1), (1, 1)),
        dimension_numbers=("NCHW", "OIHW", "NCHW"))
    y = y + bias.reshape(1, -1, 1, 1)
    mean = jnp.mean(y, axis=(0, 2, 3), keepdims=True)
    var = jnp.mean((y - mean) ** 2, axis=(0, 2, 3), keepdims=True)
    y = (y - mean) / jnp.sqrt(var + eps)
    y = y * gamma.reshape(1, -1, 1, 1) + beta.reshape(1, -1, 1, 1)
    return jnp.where(y > 0, y, neg_slope * y)


if __name__ == "__main__":
    key = jax.random.PRNGKey(0)
    k_x, k_w, k_b = jax.random.split(key, 3)

    N, Cin, H, W = 2, 4, 16, 16
    Cout = 8
    fan_in = Cin * 3 * 3
    bound = 1.0 / (fan_in ** 0.5)

    x = jax.random.normal(k_x, (N, Cin, H, W), dtype=jnp.float32)
    w = jax.random.normal(k_w, (Cout, Cin, 3, 3), dtype=jnp.float32) * bound
    b = jax.random.uniform(k_b, (Cout,), jnp.float32, minval=-bound, maxval=bound)
    gamma = jnp.ones((Cout,), jnp.float32)       # BatchNorm2d default init
    beta = jnp.zeros((Cout,), jnp.float32)

    # stride=1 with explicit multi-row-block tiling (exercises halo + stats combine),
    # stride=1 auto tiling, stride=2 auto tiling.
    for stride, br in ((1, 8), (1, None), (2, None)):
        out = conv_block(x, w, b, gamma, beta, stride=stride, block_rows=br)
        out = jax.block_until_ready(out)
        ref = _reference(x, w, b, gamma, beta, stride)
        assert out.shape == ref.shape, (out.shape, ref.shape)
        err = float(jnp.max(jnp.abs(out - ref)))
        assert err < 1e-4, (stride, br, err)

    print("KERNEL_OK")
</pallas_src>

<mosaic_0001>
module attributes {stable_mosaic.version = 11 : i64} {
  func.func @kernel(%arg0: i32, %arg1: i32, %arg2: memref<1x8x18x4xf32, #tpu.memory_space<vmem>>, %arg3: memref<1x8x18x4xf32, #tpu.memory_space<vmem>>, %arg4: memref<9x4x8xf32, #tpu.memory_space<vmem>>, %arg5: memref<1x8xf32, #tpu.memory_space<vmem>>, %arg6: memref<1x8x16x8xf32, #tpu.memory_space<vmem>>, %arg7: memref<1x2x8xf32, #tpu.memory_space<vmem>>) attributes {dimension_semantics = [#tpu.dimension_semantics<parallel>, #tpu.dimension_semantics<parallel>], iteration_bounds = array<i64: 2, 2>, scalar_prefetch = 0 : i64, scratch_operands = 0 : i64, tpu.core_type = #tpu.core_type<tc>, window_params = [{transform_indices = @transform_0, window_bounds = array<i64: 1, 8, 18, 4>}, {transform_indices = @transform_1, window_bounds = array<i64: 1, 8, 18, 4>}, {pipeline_mode = #tpu.pipeline_mode<synchronous>, transform_indices = @transform_2, window_bounds = array<i64: 9, 4, 8>}, {pipeline_mode = #tpu.pipeline_mode<synchronous>, transform_indices = @transform_3, window_bounds = array<i64: 1, 8>}, {transform_indices = @transform_4, window_bounds = array<i64: 1, 8, 16, 8>}, {transform_indices = @transform_5, window_bounds = array<i64: 1, 2, 8>}]} {
    %c0 = arith.constant 0 : index
    %c0_0 = arith.constant 0 : index
    %c0_1 = arith.constant 0 : index
    %c0_2 = arith.constant 0 : index
    %0 = vector.load %arg2[%c0, %c0_0, %c0_1, %c0_2] : memref<1x8x18x4xf32, #tpu.memory_space<vmem>>, vector<1x8x18x4xf32>
    %1 = vector.shape_cast %0 : vector<1x8x18x4xf32> to vector<8x18x4xf32>
    %c0_3 = arith.constant 0 : index
    %c0_4 = arith.constant 0 : index
    %c0_5 = arith.constant 0 : index
    %c0_6 = arith.constant 0 : index
    %2 = vector.load %arg3[%c0_3, %c0_4, %c0_5, %c0_6] : memref<1x8x18x4xf32, #tpu.memory_space<vmem>>, vector<1x2x18x4xf32>
    %3 = vector.shape_cast %2 : vector<1x2x18x4xf32> to vector<2x18x4xf32>
    %4 = tpu.concatenate %1, %3 in 0 : vector<8x18x4xf32>, vector<2x18x4xf32> -> vector<10x18x4xf32>
    %cst = arith.constant 0.000000e+00 : f32
    %5 = vector.broadcast %cst : f32 to vector<128x8xf32>
    %6 = vector.extract_strided_slice %4 {offsets = [0, 0, 0], sizes = [8, 18, 4], strides = [1, 1, 1]} : vector<10x18x4xf32> to vector<8x18x4xf32>
    %7 = vector.extract_strided_slice %6 {offsets = [0, 0, 0], sizes = [8, 16, 4], strides = [1, 1, 1]} : vector<8x18x4xf32> to vector<8x16x4xf32>
    %8 = vector.extract_strided_slice %6 {offsets = [0, 1, 0], sizes = [8, 16, 4], strides = [1, 1, 1]} : vector<8x18x4xf32> to vector<8x16x4xf32>
    %9 = vector.extract_strided_slice %6 {offsets = [0, 2, 0], sizes = [8, 16, 4], strides = [1, 1, 1]} : vector<8x18x4xf32> to vector<8x16x4xf32>
    %10 = vector.shape_cast %7 : vector<8x16x4xf32> to vector<128x4xf32>
    %c0_7 = arith.constant 0 : index
    %c0_8 = arith.constant 0 : index
    %c0_9 = arith.constant 0 : index
    %11 = vector.load %arg4[%c0_7, %c0_8, %c0_9] : memref<9x4x8xf32, #tpu.memory_space<vmem>>, vector<1x4x8xf32>
    %12 = vector.shape_cast %11 : vector<1x4x8xf32> to vector<4x8xf32>
    %cst_10 = arith.constant dense<0.000000e+00> : vector<128x8xf32>
    %13 = tpu.matmul %10, %12, %cst_10 {dimension_numbers = #tpu.dot_dimension_numbers<[1], [0], [0], [1], [0, 0, 1, 1], [], []>} : vector<128x4xf32>, vector<4x8xf32>, vector<128x8xf32> -> vector<128x8xf32>
    %14 = arith.addf %5, %13 : vector<128x8xf32>
    %15 = vector.shape_cast %8 : vector<8x16x4xf32> to vector<128x4xf32>
    %c1 = arith.constant 1 : index
    %c0_11 = arith.constant 0 : index
    %c0_12 = arith.constant 0 : index
    %16 = vector.load %arg4[%c1, %c0_11, %c0_12] : memref<9x4x8xf32, #tpu.memory_space<vmem>>, vector<1x4x8xf32>
    %17 = vector.shape_cast %16 : vector<1x4x8xf32> to vector<4x8xf32>
    %cst_13 = arith.constant dense<0.000000e+00> : vector<128x8xf32>
    %18 = tpu.matmul %15, %17, %cst_13 {dimension_numbers = #tpu.dot_dimension_numbers<[1], [0], [0], [1], [0, 0, 1, 1], [], []>} : vector<128x4xf32>, vector<4x8xf32>, vector<128x8xf32> -> vector<128x8xf32>
    %19 = arith.addf %14, %18 : vector<128x8xf32>
    %20 = vector.shape_cast %9 : vector<8x16x4xf32> to vector<128x4xf32>
    %c2 = arith.constant 2 : index
    %c0_14 = arith.constant 0 : index
    %c0_15 = arith.constant 0 : index
    %21 = vector.load %arg4[%c2, %c0_14, %c0_15] : memref<9x4x8xf32, #tpu.memory_space<vmem>>, vector<1x4x8xf32>
    %22 = vector.shape_cast %21 : vector<1x4x8xf32> to vector<4x8xf32>
    %cst_16 = arith.constant dense<0.000000e+00> : vector<128x8xf32>
    %23 = tpu.matmul %20, %22, %cst_16 {dimension_numbers = #tpu.dot_dimension_numbers<[1], [0], [0], [1], [0, 0, 1, 1], [], []>} : vector<128x4xf32>, vector<4x8xf32>, vector<128x8xf32> -> vector<128x8xf32>
    %24 = arith.addf %19, %23 : vector<128x8xf32>
    %25 = vector.extract_strided_slice %4 {offsets = [1, 0, 0], sizes = [8, 18, 4], strides = [1, 1, 1]} : vector<10x18x4xf32> to vector<8x18x4xf32>
    %26 = vector.extract_strided_slice %25 {offsets = [0, 0, 0], sizes = [8, 16, 4], strides = [1, 1, 1]} : vector<8x18x4xf32> to vector<8x16x4xf32>
    %27 = vector.extract_strided_slice %25 {offsets = [0, 1, 0], sizes = [8, 16, 4], strides = [1, 1, 1]} : vector<8x18x4xf32> to vector<8x16x4xf32>
    %28 = vector.extract_strided_slice %25 {offsets = [0, 2, 0], sizes = [8, 16, 4], strides = [1, 1, 1]} : vector<8x18x4xf32> to vector<8x16x4xf32>
    %29 = vector.shape_cast %26 : vector<8x16x4xf32> to vector<128x4xf32>
    %c3 = arith.constant 3 : index
    %c0_17 = arith.constant 0 : index
    %c0_18 = arith.constant 0 : index
    %30 = vector.load %arg4[%c3, %c0_17, %c0_18] : memref<9x4x8xf32, #tpu.memory_space<vmem>>, vector<1x4x8xf32>
    %31 = vector.shape_cast %30 : vector<1x4x8xf32> to vector<4x8xf32>
    %cst_19 = arith.constant dense<0.000000e+00> : vector<128x8xf32>
    %32 = tpu.matmul %29, %31, %cst_19 {dimension_numbers = #tpu.dot_dimension_numbers<[1], [0], [0], [1], [0, 0, 1, 1], [], []>} : vector<128x4xf32>, vector<4x8xf32>, vector<128x8xf32> -> vector<128x8xf32>
    %33 = arith.addf %24, %32 : vector<128x8xf32>
    %34 = vector.shape_cast %27 : vector<8x16x4xf32> to vector<128x4xf32>
    %c4 = arith.constant 4 : index
    %c0_20 = arith.constant 0 : index
    %c0_21 = arith.constant 0 : index
    %35 = vector.load %arg4[%c4, %c0_20, %c0_21] : memref<9x4x8xf32, #tpu.memory_space<vmem>>, vector<1x4x8xf32>
    %36 = vector.shape_cast %35 : vector<1x4x8xf32> to vector<4x8xf32>
    %cst_22 = arith.constant dense<0.000000e+00> : vector<128x8xf32>
    %37 = tpu.matmul %34, %36, %cst_22 {dimension_numbers = #tpu.dot_dimension_numbers<[1], [0], [0], [1], [0, 0, 1, 1], [], []>} : vector<128x4xf32>, vector<4x8xf32>, vector<128x8xf32> -> vector<128x8xf32>
    %38 = arith.addf %33, %37 : vector<128x8xf32>
    %39 = vector.shape_cast %28 : vector<8x16x4xf32> to vector<128x4xf32>
    %c5 = arith.constant 5 : index
    %c0_23 = arith.constant 0 : index
    %c0_24 = arith.constant 0 : index
    %40 = vector.load %arg4[%c5, %c0_23, %c0_24] : memref<9x4x8xf32, #tpu.memory_space<vmem>>, vector<1x4x8xf32>
    %41 = vector.shape_cast %40 : vector<1x4x8xf32> to vector<4x8xf32>
    %cst_25 = arith.constant dense<0.000000e+00> : vector<128x8xf32>
    %42 = tpu.matmul %39, %41, %cst_25 {dimension_numbers = #tpu.dot_dimension_numbers<[1], [0], [0], [1], [0, 0, 1, 1], [], []>} : vector<128x4xf32>, vector<4x8xf32>, vector<128x8xf32> -> vector<128x8xf32>
    %43 = arith.addf %38, %42 : vector<128x8xf32>
    %44 = vector.extract_strided_slice %4 {offsets = [2, 0, 0], sizes = [8, 18, 4], strides = [1, 1, 1]} : vector<10x18x4xf32> to vector<8x18x4xf32>
    %45 = vector.extract_strided_slice %44 {offsets = [0, 0, 0], sizes = [8, 16, 4], strides = [1, 1, 1]} : vector<8x18x4xf32> to vector<8x16x4xf32>
    %46 = vector.extract_strided_slice %44 {offsets = [0, 1, 0], sizes = [8, 16, 4], strides = [1, 1, 1]} : vector<8x18x4xf32> to vector<8x16x4xf32>
    %47 = vector.extract_strided_slice %44 {offsets = [0, 2, 0], sizes = [8, 16, 4], strides = [1, 1, 1]} : vector<8x18x4xf32> to vector<8x16x4xf32>
    %48 = vector.shape_cast %45 : vector<8x16x4xf32> to vector<128x4xf32>
    %c6 = arith.constant 6 : index
    %c0_26 = arith.constant 0 : index
    %c0_27 = arith.constant 0 : index
    %49 = vector.load %arg4[%c6, %c0_26, %c0_27] : memref<9x4x8xf32, #tpu.memory_space<vmem>>, vector<1x4x8xf32>
    %50 = vector.shape_cast %49 : vector<1x4x8xf32> to vector<4x8xf32>
    %cst_28 = arith.constant dense<0.000000e+00> : vector<128x8xf32>
    %51 = tpu.matmul %48, %50, %cst_28 {dimension_numbers = #tpu.dot_dimension_numbers<[1], [0], [0], [1], [0, 0, 1, 1], [], []>} : vector<128x4xf32>, vector<4x8xf32>, vector<128x8xf32> -> vector<128x8xf32>
    %52 = arith.addf %43, %51 : vector<128x8xf32>
    %53 = vector.shape_cast %46 : vector<8x16x4xf32> to vector<128x4xf32>
    %c7 = arith.constant 7 : index
    %c0_29 = arith.constant 0 : index
    %c0_30 = arith.constant 0 : index
    %54 = vector.load %arg4[%c7, %c0_29, %c0_30] : memref<9x4x8xf32, #tpu.memory_space<vmem>>, vector<1x4x8xf32>
    %55 = vector.shape_cast %54 : vector<1x4x8xf32> to vector<4x8xf32>
    %cst_31 = arith.constant dense<0.000000e+00> : vector<128x8xf32>
    %56 = tpu.matmul %53, %55, %cst_31 {dimension_numbers = #tpu.dot_dimension_numbers<[1], [0], [0], [1], [0, 0, 1, 1], [], []>} : vector<128x4xf32>, vector<4x8xf32>, vector<128x8xf32> -> vector<128x8xf32>
    %57 = arith.addf %52, %56 : vector<128x8xf32>
    %58 = vector.shape_cast %47 : vector<8x16x4xf32> to vector<128x4xf32>
    %c8 = arith.constant 8 : index
    %c0_32 = arith.constant 0 : index
    %c0_33 = arith.constant 0 : index
    %59 = vector.load %arg4[%c8, %c0_32, %c0_33] : memref<9x4x8xf32, #tpu.memory_space<vmem>>, vector<1x4x8xf32>
    %60 = vector.shape_cast %59 : vector<1x4x8xf32> to vector<4x8xf32>
    %cst_34 = arith.constant dense<0.000000e+00> : vector<128x8xf32>
    %61 = tpu.matmul %58, %60, %cst_34 {dimension_numbers = #tpu.dot_dimension_numbers<[1], [0], [0], [1], [0, 0, 1, 1], [], []>} : vector<128x4xf32>, vector<4x8xf32>, vector<128x8xf32> -> vector<128x8xf32>
    %62 = arith.addf %57, %61 : vector<128x8xf32>
    %c0_35 = arith.constant 0 : index
    %c0_36 = arith.constant 0 : index
    %63 = vector.load %arg5[%c0_35, %c0_36] : memref<1x8xf32, #tpu.memory_space<vmem>>, vector<1x8xf32>
    %64 = vector.broadcast %63 : vector<1x8xf32> to vector<128x8xf32>
    %65 = arith.addf %62, %64 : vector<128x8xf32>
    %66 = vector.shape_cast %65 : vector<128x8xf32> to vector<8x16x8xf32>
    %c0_37 = arith.constant 0 : index
    %c0_38 = arith.constant 0 : index
    %c0_39 = arith.constant 0 : index
    %c0_40 = arith.constant 0 : index
    %67 = vector.load %arg6[%c0_37, %c0_38, %c0_39, %c0_40] : memref<1x8x16x8xf32, #tpu.memory_space<vmem>>, vector<1x8x16x8xf32>
    %68 = vector.shape_cast %67 : vector<1x8x16x8xf32> to vector<8x16x8xf32>
    %69 = vector.shape_cast %66 : vector<8x16x8xf32> to vector<1x8x16x8xf32>
    tpu.vector_store %arg6[%c0_37, %c0_38, %c0_39, %c0_40], %69 {strides = array<i32>} : memref<1x8x16x8xf32, #tpu.memory_space<vmem>>, vector<1x8x16x8xf32>,
    %cst_41 = arith.constant dense<0.000000e+00> : vector<8xf32>
    %70 = vector.multi_reduction <add>, %65, %cst_41 [0] : vector<128x8xf32> to vector<8xf32>
    %71 = vector.shape_cast %70 : vector<8xf32> to vector<1x8xf32>
    %cst_42 = arith.constant 7.812500e-03 : f32
    %72 = vector.broadcast %cst_42 : f32 to vector<1x8xf32>
    %73 = arith.mulf %71, %72 : vector<1x8xf32>
    %74 = vector.broadcast %73 : vector<1x8xf32> to vector<128x8xf32>
    %75 = arith.subf %65, %74 : vector<128x8xf32>
    %76 = arith.mulf %75, %75 : vector<128x8xf32>
    %cst_43 = arith.constant dense<0.000000e+00> : vector<8xf32>
    %77 = vector.multi_reduction <add>, %76, %cst_43 [0] : vector<128x8xf32> to vector<8xf32>
    %78 = vector.shape_cast %77 : vector<8xf32> to vector<1x8xf32>
    %c0_44 = arith.constant 0 : index
    %c0_45 = arith.constant 0 : index
    %c0_46 = arith.constant 0 : index
    %79 = vector.load %arg7[%c0_44, %c0_45, %c0_46] : memref<1x2x8xf32, #tpu.memory_space<vmem>>, vector<1x1x8xf32>
    %80 = vector.shape_cast %79 : vector<1x1x8xf32> to vector<1x8xf32>
    %81 = vector.shape_cast %71 : vector<1x8xf32> to vector<1x1x8xf32>
    tpu.vector_store %arg7[%c0_44, %c0_45, %c0_46], %81 {strides = array<i32>} : memref<1x2x8xf32, #tpu.memory_space<vmem>>, vector<1x1x8xf32>,
    %c0_47 = arith.constant 0 : index
    %c1_48 = arith.constant 1 : index
    %c0_49 = arith.constant 0 : index
    %82 = vector.load %arg7[%c0_47, %c1_48, %c0_49] : memref<1x2x8xf32, #tpu.memory_space<vmem>>, vector<1x1x8xf32>
    %83 = vector.shape_cast %82 : vector<1x1x8xf32> to vector<1x8xf32>
    %84 = vector.shape_cast %78 : vector<1x8xf32> to vector<1x1x8xf32>
    tpu.vector_store %arg7[%c0_47, %c1_48, %c0_49], %84 {strides = array<i32>} : memref<1x2x8xf32, #tpu.memory_space<vmem>>, vector<1x1x8xf32>,
    return
  }
  func.func @transform_0(%arg0: i32, %arg1: i32) -> (i32, i32, i32, i32) {
    %c0_i32 = arith.constant 0 : i32
    %c0_i32_0 = arith.constant 0 : i32
    %c0_i32_1 = arith.constant 0 : i32
    return %arg0, %arg1, %c0_i32, %c0_i32_0 : i32, i32, i32, i32
  }
  func.func @transform_1(%arg0: i32, %arg1: i32) -> (i32, i32, i32, i32) {
    %c1_i32 = arith.constant 1 : i32
    %0 = arith.addi %arg1, %c1_i32 : i32
    %c1_i32_0 = arith.constant 1 : i32
    %1 = arith.muli %0, %c1_i32_0 : i32
    %c0_i32 = arith.constant 0 : i32
    %c0_i32_1 = arith.constant 0 : i32
    %c0_i32_2 = arith.constant 0 : i32
    return %arg0, %1, %c0_i32, %c0_i32_1 : i32, i32, i32, i32
  }
  func.func @transform_2(%arg0: i32, %arg1: i32) -> (i32, i32, i32) {
    %c0_i32 = arith.constant 0 : i32
    %c0_i32_0 = arith.constant 0 : i32
    %c0_i32_1 = arith.constant 0 : i32
    %c0_i32_2 = arith.constant 0 : i32
    return %c0_i32, %c0_i32_0, %c0_i32_1 : i32, i32, i32
  }
  func.func @transform_3(%arg0: i32, %arg1: i32) -> (i32, i32) {
    %c0_i32 = arith.constant 0 : i32
    %c0_i32_0 = arith.constant 0 : i32
    %c0_i32_1 = arith.constant 0 : i32
    return %c0_i32, %c0_i32_0 : i32, i32
  }
  func.func @transform_4(%arg0: i32, %arg1: i32) -> (i32, i32, i32, i32) {
    %c0_i32 = arith.constant 0 : i32
    %c0_i32_0 = arith.constant 0 : i32
    %c0_i32_1 = arith.constant 0 : i32
    return %arg0, %arg1, %c0_i32, %c0_i32_0 : i32, i32, i32, i32
  }
  func.func @transform_5(%arg0: i32, %arg1: i32) -> (i32, i32, i32) {
    %c2_i32 = arith.constant 2 : i32
    %0 = arith.muli %arg0, %c2_i32 : i32
    %1 = arith.addi %0, %arg1 : i32
    %c0_i32 = arith.constant 0 : i32
    %c0_i32_0 = arith.constant 0 : i32
    %c0_i32_1 = arith.constant 0 : i32
    return %1, %c0_i32, %c0_i32_0 : i32, i32, i32
  }
}

module attributes {stable_mosaic.version = 11 : i64} {
  func.func @kernel(%arg0: i32, %arg1: i32, %arg2: memref<1x16x16x8xf32, #tpu.memory_space<vmem>>, %arg3: memref<1x8xf32, #tpu.memory_space<vmem>>, %arg4: memref<1x8xf32, #tpu.memory_space<vmem>>, %arg5: memref<1x16x16x8xf32, #tpu.memory_space<vmem>>) attributes {dimension_semantics = [#tpu.dimension_semantics<parallel>, #tpu.dimension_semantics<parallel>], iteration_bounds = array<i64: 2, 1>, scalar_prefetch = 0 : i64, scratch_operands = 0 : i64, tpu.core_type = #tpu.core_type<tc>, window_params = [{transform_indices = @transform_0, window_bounds = array<i64: 1, 16, 16, 8>}, {pipeline_mode = #tpu.pipeline_mode<synchronous>, transform_indices = @transform_1, window_bounds = array<i64: 1, 8>}, {pipeline_mode = #tpu.pipeline_mode<synchronous>, transform_indices = @transform_2, window_bounds = array<i64: 1, 8>}, {transform_indices = @transform_3, window_bounds = array<i64: 1, 16, 16, 8>}]} {
    %c0 = arith.constant 0 : index
    %c0_0 = arith.constant 0 : index
    %c0_1 = arith.constant 0 : index
    %c0_2 = arith.constant 0 : index
    %0 = vector.load %arg2[%c0, %c0_0, %c0_1, %c0_2] : memref<1x16x16x8xf32, #tpu.memory_space<vmem>>, vector<1x16x16x8xf32>
    %1 = vector.shape_cast %0 : vector<1x16x16x8xf32> to vector<16x16x8xf32>
    %c0_3 = arith.constant 0 : index
    %c0_4 = arith.constant 0 : index
    %2 = vector.load %arg3[%c0_3, %c0_4] : memref<1x8xf32, #tpu.memory_space<vmem>>, vector<1x8xf32>
    %3 = vector.shape_cast %2 : vector<1x8xf32> to vector<1x1x8xf32>
    %4 = vector.broadcast %3 : vector<1x1x8xf32> to vector<16x16x8xf32>
    %5 = arith.mulf %1, %4 : vector<16x16x8xf32>
    %c0_5 = arith.constant 0 : index
    %c0_6 = arith.constant 0 : index
    %6 = vector.load %arg4[%c0_5, %c0_6] : memref<1x8xf32, #tpu.memory_space<vmem>>, vector<1x8xf32>
    %7 = vector.shape_cast %6 : vector<1x8xf32> to vector<1x1x8xf32>
    %8 = vector.broadcast %7 : vector<1x1x8xf32> to vector<16x16x8xf32>
    %9 = arith.addf %5, %8 : vector<16x16x8xf32>
    %cst = arith.constant 0.000000e+00 : f32
    %10 = vector.broadcast %cst : f32 to vector<16x16x8xf32>
    %11 = arith.cmpf ogt, %9, %10 : vector<16x16x8xf32>
    %cst_7 = arith.constant 2.000000e-01 : f32
    %12 = vector.broadcast %cst_7 : f32 to vector<16x16x8xf32>
    %13 = arith.mulf %12, %9 : vector<16x16x8xf32>
    %14 = arith.select %11, %9, %13 : vector<16x16x8xi1>, vector<16x16x8xf32>
    %c0_8 = arith.constant 0 : index
    %c0_9 = arith.constant 0 : index
    %c0_10 = arith.constant 0 : index
    %c0_11 = arith.constant 0 : index
    %15 = vector.load %arg5[%c0_8, %c0_9, %c0_10, %c0_11] : memref<1x16x16x8xf32, #tpu.memory_space<vmem>>, vector<1x16x16x8xf32>
    %16 = vector.shape_cast %15 : vector<1x16x16x8xf32> to vector<16x16x8xf32>
    %17 = vector.shape_cast %14 : vector<16x16x8xf32> to vector<1x16x16x8xf32>
    tpu.vector_store %arg5[%c0_8, %c0_9, %c0_10, %c0_11], %17 {strides = array<i32>} : memref<1x16x16x8xf32, #tpu.memory_space<vmem>>, vector<1x16x16x8xf32>,
    return
  }
  func.func @transform_0(%arg0: i32, %arg1: i32) -> (i32, i32, i32, i32) {
    %c0_i32 = arith.constant 0 : i32
    %c0_i32_0 = arith.constant 0 : i32
    %c0_i32_1 = arith.constant 0 : i32
    return %arg0, %arg1, %c0_i32, %c0_i32_0 : i32, i32, i32, i32
  }
  func.func @transform_1(%arg0: i32, %arg1: i32) -> (i32, i32) {
    %c0_i32 = arith.constant 0 : i32
    %c0_i32_0 = arith.constant 0 : i32
    %c0_i32_1 = arith.constant 0 : i32
    return %c0_i32, %c0_i32_0 : i32, i32
  }
  func.func @transform_2(%arg0: i32, %arg1: i32) -> (i32, i32) {
    %c0_i32 = arith.constant 0 : i32
    %c0_i32_0 = arith.constant 0 : i32
    %c0_i32_1 = arith.constant 0 : i32
    return %c0_i32, %c0_i32_0 : i32, i32
  }
  func.func @transform_3(%arg0: i32, %arg1: i32) -> (i32, i32, i32, i32) {
    %c0_i32 = arith.constant 0 : i32
    %c0_i32_0 = arith.constant 0 : i32
    %c0_i32_1 = arith.constant 0 : i32
    return %arg0, %arg1, %c0_i32, %c0_i32_0 : i32, i32, i32, i32
  }
}

</mosaic_0001>

<bundles_post_ra>
// kernel: conv_block.3
= control target key start
LH: loop header
LB: loop body
LE: loop exit
PB: predicated region body
PF: predicated region fallthrough
CT: control target
= control target key end

     0   :  { %s627_s12 = smov 0   ;;  %s629_s13 = smov 0   ;;  %s885_s0 = inlined_call_operand.vmem [shape: f32[2,16,16,8], index: 0, kind: input, shape index: {}, may-alias: {0,3}]   ;;  %s886_s1 = inlined_call_operand.vmem [shape: f32[1,8], index: 1, kind: input, shape index: {}]   ;;  %s887_s2 = inlined_call_operand.vmem [shape: f32[1,8], index: 2, kind: input, shape index: {}]   ;;  %s888_s3 = inlined_call_operand.vmem [shape: f32[2,16,16,8], index: 3, kind: output, shape index: {}, may-alias: {0,3}]  }
   0x1   :  { %s631_s14 = smov 0  }
   0x2 LB: > { %s25_s15 = sadd.s32 1, %s601_s13  ;;  %p548_p0 = scmp.ge.s32.totalorder %s605_s14, 1  ;;  %s605_s14 = sphi %s631_s14, %s13_s14   ;;  %s601_s13 = sphi %s629_s13, %s890_s13   ;;  %s597_s12 = sphi %s627_s12, %s889_s12  }
   0x3   : > { %p27_p1 = scmp.ge.s32.totalorder %s25_s15, 2  ;;  %p159_p2 = scmp.lt.s32.totalorder %s605_s14, 3 }
   0x5   : > { %s892_s15 = smov (%p27_p1, %s25_s15), 0  ;;  %p160_p3 = pnand %p548_p0, %p159_p2 }
   0x6   : > { %p194_p4 = scmp.lt.s32.totalorder (!%p160_p3), %s597_s12, 1 }
   0x7   : > { %163 = sbr.rel (%p160_p3) target bundleno = 61 (0x3d), region = 32 }
   0xc   : > { %s894_s12 = smov (!%p194_p4, %s597_s12), 1  ;;  %v650_v0 = vld [vmem:[%s886_s1] ss:$0 sm:$0xff]  ;;  %vm415_vm0 = vcmask 64512  }
   0xd   : > { %s555_s18 = sshll.u32 %s894_s12, 8  ;;  %v663_v1 = vld [vmem:[%s887_s2] ss:$0 sm:$0xff] }
   0xe   : > { %s658_s21 = scalar_lea.vmem %s885_s0, %s555_s18  ;;  %s700_s26 = scalar_lea.vmem %s888_s3, %s555_s18 }
   0xf   : > { %v215_v2 = vld [vmem:[%s658_s21] sm:$0xff]  ;;  %v216_v3 = vld [vmem:[%s658_s21 + $0x8] sm:$0xff]  ;;  %v217_v4 = vld [vmem:[%s658_s21 + $0x10] sm:$0xff] }
  0x10   : > { %v218_v5 = vld [vmem:[%s658_s21 + $0x18] sm:$0xff]  ;;  %v219_v6 = vld [vmem:[%s658_s21 + $0x20] sm:$0xff]  ;;  %v220_v7 = vld [vmem:[%s658_s21 + $0x28] sm:$0xff]  ;;  %v251_v8 = vmul.f32 %v650_v0, %v215_v2  ;;  %v252_v9 = vmul.f32 %v650_v0, %v216_v3  ;;  %v253_v10 = vmul.f32 %v650_v0, %v217_v4 }
  0x11   : > { %v221_v11 = vld [vmem:[%s658_s21 + $0x30] sm:$0xff]  ;;  %v222_v12 = vld [vmem:[%s658_s21 + $0x38] sm:$0xff]  ;;  %v223_v13 = vld [vmem:[%s658_s21 + $0x40] sm:$0xff]  ;;  %v254_v14 = vmul.f32 %v650_v0, %v218_v5  ;;  %v255_v15 = vmul.f32 %v650_v0, %v219_v6  ;;  %v256_v16 = vmul.f32 %v650_v0, %v220_v7 }
  0x12   : > { %v224_v17 = vld [vmem:[%s658_s21 + $0x48] sm:$0xff]  ;;  %v287_v18 = vadd.f32 %v663_v1, %v251_v8  ;;  %v288_v19 = vadd.f32 %v663_v1, %v252_v9  ;;  %v289_v20 = vadd.f32 %v663_v1, %v253_v10  ;;  %v257_v21 = vmul.f32 %v650_v0, %v221_v11  ;;  %v225_v29 = vld [vmem:[%s658_s21 + $0x50] sm:$0xff]  ;;  %v226_v36 = vld [vmem:[%s658_s21 + $0x58] sm:$0xff] }
  0x13   : > { %v290_v22 = vadd.f32 %v663_v1, %v254_v14  ;;  %v291_v23 = vadd.f32 %v663_v1, %v255_v15  ;;  %v292_v24 = vadd.f32 %v663_v1, %v256_v16  ;;  %v258_v25 = vmul.f32 %v650_v0, %v222_v12  ;;  %v227_v37 = vld [vmem:[%s658_s21 + $0x60] sm:$0xff]  ;;  %v228_v38 = vld [vmem:[%s658_s21 + $0x68] sm:$0xff]  ;;  %v229_v39 = vld [vmem:[%s658_s21 + $0x70] sm:$0xff] }
  0x14   : > { %vm319_vm1 = vcmp.gt.f32.partialorder %v287_v18, 0.0  ;;  %v351_v26 = vmul.f32 0.2, %v287_v18  ;;  %v293_v27 = vadd.f32 %v663_v1, %v257_v21  ;;  %v259_v28 = vmul.f32 %v650_v0, %v223_v13  ;;  %v230_v40 = vld [vmem:[%s658_s21 + $0x78] sm:$0xff]  ;;  %v231_v41 = vld [vmem:[%s658_s21 + $0x80] sm:$0xff]  ;;  %v232_v42 = vld [vmem:[%s658_s21 + $0x88] sm:$0xff] }
  0x15   : > { %vm320_vm2 = vcmp.gt.f32.partialorder %v288_v19, 0.0  ;;  %v352_v30 = vmul.f32 0.2, %v288_v19  ;;  %v294_v31 = vadd.f32 %v663_v1, %v258_v25  ;;  %v260_v32 = vmul.f32 %v650_v0, %v224_v17  ;;  %v710_v43 = vld [vmem:[%s658_s21 + $0x90] sm:$0xff]  ;;  %v713_v44 = vld [vmem:[%s658_s21 + $0x98] sm:$0xff]  ;;  %v716_v45 = vld [vmem:[%s658_s21 + $0xa0] sm:$0xff] }
  0x16   : > { %v383_v33 = vsel %vm319_vm1, %v287_v18, %v351_v26  ;;  %vm321_vm3 = vcmp.gt.f32.partialorder %v289_v20, 0.0  ;;  %v353_v34 = vmul.f32 0.2, %v289_v20  ;;  %v295_v35 = vadd.f32 %v663_v1, %v259_v28  ;;  %v719_v46 = vld [vmem:[%s658_s21 + $0xa8] sm:$0xff]  ;;  %v722_v47 = vld [vmem:[%s658_s21 + $0xb0] sm:$0xff]  ;;  %v725_v48 = vld [vmem:[%s658_s21 + $0xb8] sm:$0xff] }
  0x17   : > { %v728_v49 = vld [vmem:[%s658_s21 + $0xc0] sm:$0xff]  ;;  %v731_v50 = vld [vmem:[%s658_s21 + $0xc8] sm:$0xff]  ;;  %v734_v51 = vld [vmem:[%s658_s21 + $0xd0] sm:$0xff]  ;;  %v384_v52 = vsel %vm320_vm2, %v288_v19, %v352_v30  ;;  %vm322_vm4 = vcmp.gt.f32.partialorder %v290_v22, 0.0  ;;  %v354_v53 = vmul.f32 0.2, %v290_v22  ;;  %v296_v54 = vadd.f32 %v663_v1, %v260_v32 }
  0x18   : > { %v739_v55 = vld [vmem:[%s658_s21 + $0xd8] sm:$0xff]  ;;  %v742_v56 = vld [vmem:[%s658_s21 + $0xe0] sm:$0xff]  ;;  %v745_v57 = vld [vmem:[%s658_s21 + $0xe8] sm:$0xff]  ;;  %v385_v58 = vsel %vm321_vm3, %v289_v20, %v353_v34  ;;  %vm323_vm5 = vcmp.gt.f32.partialorder %v291_v23, 0.0  ;;  %v355_v59 = vmul.f32 0.2, %v291_v23  ;;  %v261_v60 = vmul.f32 %v650_v0, %v225_v29 }
  0x19   : > { %v750_v61 = vld [vmem:[%s658_s21 + $0xf0] sm:$0xff]  ;;  %v753_v62 = vld [vmem:[%s658_s21 + $0xf8] sm:$0xff]  ;;  %v386_v63 = vsel %vm322_vm4, %v290_v22, %v354_v53  ;;  %vm324_vm6 = vcmp.gt.f32.partialorder %v292_v24, 0.0  ;;  %v356_v2 = vmul.f32 0.2, %v292_v24  ;;  %vm325_vm7 = vcmp.gt.f32.partialorder %v293_v27, 0.0 }
  0x1a   : > { %416 = vst.msk [vmem:[%s700_s26] sm:$0xff] %vm415_vm0, %v383_v33  ;;  %v387_v3 = vsel %vm323_vm5, %v291_v23, %v355_v59  ;;  %v357_v4 = vmul.f32 0.2, %v293_v27  ;;  %vm326_vm8 = vcmp.gt.f32.partialorder %v294_v31, 0.0  ;;  %v358_v5 = vmul.f32 0.2, %v294_v31 }
  0x1b   : > { %417 = vst.msk [vmem:[%s700_s26 + $0x8] sm:$0xff] %vm415_vm0, %v384_v52  ;;  %v388_v6 = vsel %vm324_vm6, %v292_v24, %v356_v2  ;;  %vm327_vm9 = vcmp.gt.f32.partialorder %v295_v35, 0.0  ;;  %v359_v7 = vmul.f32 0.2, %v295_v35  ;;  %vm328_vm10 = vcmp.gt.f32.partialorder %v296_v54, 0.0 }
  0x1c   : > { %418 = vst.msk [vmem:[%s700_s26 + $0x10] sm:$0xff] %vm415_vm0, %v385_v58  ;;  %v389_v8 = vsel %vm325_vm7, %v293_v27, %v357_v4  ;;  %v390_v9 = vsel %vm326_vm8, %v294_v31, %v358_v5  ;;  %v360_v10 = vmul.f32 0.2, %v296_v54  ;;  %v297_v11 = vadd.f32 %v663_v1, %v261_v60 }
  0x1d   : > { %419 = vst.msk [vmem:[%s700_s26 + $0x18] sm:$0xff] %vm415_vm0, %v386_v63  ;;  %v391_v12 = vsel %vm327_vm9, %v295_v35, %v359_v7  ;;  %v262_v13 = vmul.f32 %v650_v0, %v226_v36  ;;  %v263_v14 = vmul.f32 %v650_v0, %v227_v37  ;;  %v264_v15 = vmul.f32 %v650_v0, %v228_v38 }
  0x1e   : > { %420 = vst.msk [vmem:[%s700_s26 + $0x20] sm:$0xff] %vm415_vm0, %v387_v3  ;;  %v392_v16 = vsel %vm328_vm10, %v296_v54, %v360_v10  ;;  %vm329_vm11 = vcmp.gt.f32.partialorder %v297_v11, 0.0  ;;  %v361_v17 = vmul.f32 0.2, %v297_v11  ;;  %v265_v18 = vmul.f32 %v650_v0, %v229_v39 }
  0x1f   : > { %421 = vst.msk [vmem:[%s700_s26 + $0x28] sm:$0xff] %vm415_vm0, %v388_v6  ;;  %v298_v19 = vadd.f32 %v663_v1, %v262_v13  ;;  %v299_v20 = vadd.f32 %v663_v1, %v263_v14  ;;  %v300_v21 = vadd.f32 %v663_v1, %v264_v15  ;;  %v266_v22 = vmul.f32 %v650_v0, %v230_v40 }
  0x20   : > { %422 = vst.msk [vmem:[%s700_s26 + $0x30] sm:$0xff] %vm415_vm0, %v389_v8  ;;  %v393_v23 = vsel %vm329_vm11, %v297_v11, %v361_v17  ;;  %v301_v24 = vadd.f32 %v663_v1, %v265_v18  ;;  %v267_v25 = vmul.f32 %v650_v0, %v231_v41  ;;  %v268_v26 = vmul.f32 %v650_v0, %v232_v42 }
  0x21   : > { %423 = vst.msk [vmem:[%s700_s26 + $0x38] sm:$0xff] %vm415_vm0, %v390_v9  ;;  %vm330_vm12 = vcmp.gt.f32.partialorder %v298_v19, 0.0  ;;  %v362_v27 = vmul.f32 0.2, %v298_v19  ;;  %vm331_vm13 = vcmp.gt.f32.partialorder %v299_v20, 0.0  ;;  %vm332_vm14 = vcmp.gt.f32.partialorder %v300_v21, 0.0 }
  0x22   : > { %424 = vst.msk [vmem:[%s700_s26 + $0x40] sm:$0xff] %vm415_vm0, %v391_v12  ;;  %v363_v28 = vmul.f32 0.2, %v299_v20  ;;  %v364_v29 = vmul.f32 0.2, %v300_v21  ;;  %vm333_vm15 = vcmp.gt.f32.partialorder %v301_v24, 0.0  ;;  %v302_v30 = vadd.f32 %v663_v1, %v266_v22 }
  0x23   : > { %425 = vst.msk [vmem:[%s700_s26 + $0x48] sm:$0xff] %vm415_vm0, %v392_v16  ;;  %v394_v31 = vsel %vm330_vm12, %v298_v19, %v362_v27  ;;  %v365_v32 = vmul.f32 0.2, %v301_v24  ;;  %v303_v33 = vadd.f32 %v663_v1, %v267_v25  ;;  %v304_v34 = vadd.f32 %v663_v1, %v268_v26 }
  0x24   : > { %426 = vst.msk [vmem:[%s700_s26 + $0x50] sm:$0xff] %vm415_vm0, %v393_v23  ;;  %v395_v35 = vsel %vm331_vm13, %v299_v20, %v363_v28  ;;  %v396_v36 = vsel %vm332_vm14, %v300_v21, %v364_v29  ;;  %vm334_vm1 = vcmp.gt.f32.partialorder %v302_v30, 0.0  ;;  %v366_v37 = vmul.f32 0.2, %v302_v30 }
  0x25   : > { %427 = vst.msk [vmem:[%s700_s26 + $0x58] sm:$0xff] %vm415_vm0, %v394_v31  ;;  %v397_v38 = vsel %vm333_vm15, %v301_v24, %v365_v32  ;;  %vm335_vm2 = vcmp.gt.f32.partialorder %v303_v33, 0.0  ;;  %v367_v39 = vmul.f32 0.2, %v303_v33  ;;  %vm336_vm3 = vcmp.gt.f32.partialorder %v304_v34, 0.0 }
  0x26   : > { %428 = vst.msk [vmem:[%s700_s26 + $0x60] sm:$0xff] %vm415_vm0, %v395_v35  ;;  %v398_v40 = vsel %vm334_vm1, %v302_v30, %v366_v37  ;;  %v368_v41 = vmul.f32 0.2, %v304_v34  ;;  %v269_v42 = vmul.f32 %v650_v0, %v710_v43  ;;  %v270_v52 = vmul.f32 %v650_v0, %v713_v44 }
  0x27   : > { %429 = vst.msk [vmem:[%s700_s26 + $0x68] sm:$0xff] %vm415_vm0, %v396_v36  ;;  %v399_v53 = vsel %vm335_vm2, %v303_v33, %v367_v39  ;;  %v271_v54 = vmul.f32 %v650_v0, %v716_v45  ;;  %v272_v58 = vmul.f32 %v650_v0, %v719_v46  ;;  %v273_v59 = vmul.f32 %v650_v0, %v722_v47 }
  0x28   : > { %430 = vst.msk [vmem:[%s700_s26 + $0x70] sm:$0xff] %vm415_vm0, %v397_v38  ;;  %v400_v43 = vsel %vm336_vm3, %v304_v34, %v368_v41  ;;  %v305_v60 = vadd.f32 %v663_v1, %v269_v42  ;;  %v306_v44 = vadd.f32 %v663_v1, %v270_v52  ;;  %v274_v63 = vmul.f32 %v650_v0, %v725_v48 }
  0x29   : > { %431 = vst.msk [vmem:[%s700_s26 + $0x78] sm:$0xff] %vm415_vm0, %v398_v40  ;;  %v307_v45 = vadd.f32 %v663_v1, %v271_v54  ;;  %v308_v46 = vadd.f32 %v663_v1, %v272_v58  ;;  %v309_v2 = vadd.f32 %v663_v1, %v273_v59  ;;  %v275_v47 = vmul.f32 %v650_v0, %v728_v49 }
  0x2a   : > { %432 = vst.msk [vmem:[%s700_s26 + $0x80] sm:$0xff] %vm415_vm0, %v399_v53  ;;  %vm337_vm4 = vcmp.gt.f32.partialorder %v305_v60, 0.0  ;;  %v369_v3 = vmul.f32 0.2, %v305_v60  ;;  %vm338_vm5 = vcmp.gt.f32.partialorder %v306_v44, 0.0  ;;  %v310_v48 = vadd.f32 %v663_v1, %v274_v63 }
  0x2b   : > { %433 = vst.msk [vmem:[%s700_s26 + $0x88] sm:$0xff] %vm415_vm0, %v400_v43  ;;  %v370_v4 = vmul.f32 0.2, %v306_v44  ;;  %vm339_vm6 = vcmp.gt.f32.partialorder %v307_v45, 0.0  ;;  %v371_v5 = vmul.f32 0.2, %v307_v45  ;;  %v311_v6 = vadd.f32 %v663_v1, %v275_v47 }
  0x2c   : > { %v401_v7 = vsel %vm337_vm4, %v305_v60, %v369_v3  ;;  %vm340_vm7 = vcmp.gt.f32.partialorder %v308_v46, 0.0  ;;  %v372_v8 = vmul.f32 0.2, %v308_v46  ;;  %vm341_vm8 = vcmp.gt.f32.partialorder %v309_v2, 0.0 }
  0x2d   : > { %434 = vst.msk [vmem:[%s700_s26 + $0x90] sm:$0xff] %vm415_vm0, %v401_v7  ;;  %v402_v49 = vsel %vm338_vm5, %v306_v44, %v370_v4  ;;  %v403_v9 = vsel %vm339_vm6, %v307_v45, %v371_v5  ;;  %v373_v10 = vmul.f32 0.2, %v309_v2  ;;  %vm342_vm9 = vcmp.gt.f32.partialorder %v310_v48, 0.0 }
  0x2e   : > { %435 = vst.msk [vmem:[%s700_s26 + $0x98] sm:$0xff] %vm415_vm0, %v402_v49  ;;  %v404_v11 = vsel %vm340_vm7, %v308_v46, %v372_v8  ;;  %v374_v12 = vmul.f32 0.2, %v310_v48  ;;  %vm343_vm10 = vcmp.gt.f32.partialorder %v311_v6, 0.0  ;;  %v375_v13 = vmul.f32 0.2, %v311_v6 }
  0x2f   : > { %436 = vst.msk [vmem:[%s700_s26 + $0xa0] sm:$0xff] %vm415_vm0, %v403_v9  ;;  %v405_v14 = vsel %vm341_vm8, %v309_v2, %v373_v10  ;;  %v276_v15 = vmul.f32 %v650_v0, %v731_v50  ;;  %v277_v16 = vmul.f32 %v650_v0, %v734_v51  ;;  %v278_v17 = vmul.f32 %v650_v0, %v739_v55 }
  0x30   : > { %437 = vst.msk [vmem:[%s700_s26 + $0xa8] sm:$0xff] %vm415_vm0, %v404_v11  ;;  %v406_v18 = vsel %vm342_vm9, %v310_v48, %v374_v12  ;;  %v407_v19 = vsel %vm343_vm10, %v311_v6, %v375_v13  ;;  %v279_v20 = vmul.f32 %v650_v0, %v742_v56  ;;  %v280_v21 = vmul.f32 %v650_v0, %v745_v57 }
  0x31   : > { %438 = vst.msk [vmem:[%s700_s26 + $0xb0] sm:$0xff] %vm415_vm0, %v405_v14  ;;  %v312_v50 = vadd.f32 %v663_v1, %v276_v15  ;;  %v313_v51 = vadd.f32 %v663_v1, %v277_v16  ;;  %v314_v22 = vadd.f32 %v663_v1, %v278_v17  ;;  %v281_v55 = vmul.f32 %v650_v0, %v750_v61 }
  0x32   : > { %439 = vst.msk [vmem:[%s700_s26 + $0xb8] sm:$0xff] %vm415_vm0, %v406_v18  ;;  %v315_v23 = vadd.f32 %v663_v1, %v279_v20  ;;  %v316_v56 = vadd.f32 %v663_v1, %v280_v21  ;;  %v282_v57 = vmul.f32 %v650_v0, %v753_v62 }
  0x33   : > { %440 = vst.msk [vmem:[%s700_s26 + $0xc0] sm:$0xff] %vm415_vm0, %v407_v19  ;;  %vm344_vm11 = vcmp.gt.f32.partialorder %v312_v50, 0.0  ;;  %v376_v24 = vmul.f32 0.2, %v312_v50  ;;  %vm345_vm12 = vcmp.gt.f32.partialorder %v313_v51, 0.0  ;;  %vm346_vm13 = vcmp.gt.f32.partialorder %v314_v22, 0.0 }
  0x34   : > { %v377_v25 = vmul.f32 0.2, %v313_v51  ;;  %v378_v26 = vmul.f32 0.2, %v314_v22  ;;  %vm347_vm14 = vcmp.gt.f32.partialorder %v315_v23, 0.0  ;;  %vm348_vm15 = vcmp.gt.f32.partialorder %v316_v56, 0.0 }
  0x35   : > { %v408_v61 = vsel %vm344_vm11, %v312_v50, %v376_v24  ;;  %v379_v27 = vmul.f32 0.2, %v315_v23  ;;  %v380_v28 = vmul.f32 0.2, %v316_v56  ;;  %v317_v29 = vadd.f32 %v663_v1, %v281_v55 }
  0x36   : > { %441 = vst.msk [vmem:[%s700_s26 + $0xc8] sm:$0xff] %vm415_vm0, %v408_v61  ;;  %v409_v0 = vsel %vm345_vm12, %v313_v51, %v377_v25  ;;  %v410_v62 = vsel %vm346_vm13, %v314_v22, %v378_v26  ;;  %v318_v30 = vadd.f32 %v663_v1, %v282_v57 }
  0x37   : > { %442 = vst.msk [vmem:[%s700_s26 + $0xd0] sm:$0xff] %vm415_vm0, %v409_v0  ;;  %v411_v31 = vsel %vm347_vm14, %v315_v23, %v379_v27  ;;  %v412_v32 = vsel %vm348_vm15, %v316_v56, %v380_v28  ;;  %vm349_vm1 = vcmp.gt.f32.partialorder %v317_v29, 0.0  ;;  %v381_v33 = vmul.f32 0.2, %v317_v29 }
  0x38   : > { %443 = vst.msk [vmem:[%s700_s26 + $0xd8] sm:$0xff] %vm415_vm0, %v410_v62  ;;  %vm350_vm2 = vcmp.gt.f32.partialorder %v318_v30, 0.0  ;;  %v382_v34 = vmul.f32 0.2, %v318_v30 }
  0x39   : > { %444 = vst.msk [vmem:[%s700_s26 + $0xe0] sm:$0xff] %vm415_vm0, %v411_v31  ;;  %v413_v35 = vsel %vm349_vm1, %v317_v29, %v381_v33 }
  0x3a   : > { %445 = vst.msk [vmem:[%s700_s26 + $0xe8] sm:$0xff] %vm415_vm0, %v412_v32  ;;  %v414_v36 = vsel %vm350_vm2, %v318_v30, %v382_v34 }
  0x3b   : > { %446 = vst.msk [vmem:[%s700_s26 + $0xf0] sm:$0xff] %vm415_vm0, %v413_v35 }
  0x3c   : > { %447 = vst.msk [vmem:[%s700_s26 + $0xf8] sm:$0xff] %vm415_vm0, %v414_v36 }
  0x3d PF: > { %s13_s14 = sadd.s32 1, %s605_s14   ;;  %s889_s12 = smov %s601_s13 }
  0x3e   : > { %p10_p5 = scmp.ge.s32.totalorder %s13_s14, 4   ;;  %s890_s13 = smov %s892_s15 }
  0x40   :  { %12 = sbr.rel (!%p10_p5) target bundleno = 2 (0x2), region = 62 }

// kernel: conv_block.2
= control target key start
LH: loop header
LB: loop body
LE: loop exit
PB: predicated region body
PF: predicated region fallthrough
CT: control target
= control target key end

     0   :  { %s1964_s18 = smov 0   ;;  %s1966_s19 = smov 0   ;;  %s2813_s0 = inlined_call_operand.vmem [shape: f32[2,24,18,4], index: 0, kind: input, shape index: {}, may-alias: {0,1}]   ;;  %s2814_s1 = inlined_call_operand.vmem [shape: f32[2,24,18,4], index: 1, kind: input, shape index: {}, may-alias: {0,1}]   ;;  %s2815_s2 = inlined_call_operand.vmem [shape: f32[9,4,8], index: 2, kind: input, shape index: {}]   ;;  %s2816_s3 = inlined_call_operand.vmem [shape: f32[1,8], index: 3, kind: input, shape index: {}]   ;;  %s2817_s4 = inlined_call_operand.vmem [shape: f32[2,16,16,8], index: 4, kind: output, shape index: {0}]   ;;  %s2818_s5 = inlined_call_operand.vmem [shape: f32[4,2,8], index: 5, kind: output, shape index: {1}]  }
   0x1   :  { %s1968_s20 = smov 0   ;;  %s1970_s21 = smov 0  }
   0x2   :  { %s1972_s22 = smov 0  }
   0x3 LB: > { %s25_s23 = sadd.s32 1, %s1924_s20  ;;  %s28_s24 = sadd.s32 1, %s1928_s21  ;;  %s1932_s22 = sphi %s1972_s22, %s16_s22   ;;  %s1928_s21 = sphi %s1970_s21, %s2831_s21   ;;  %s1924_s20 = sphi %s1968_s20, %s2830_s20   ;;  %s1920_s19 = sphi %s1966_s19, %s2829_s19   ;;  %s1916_s18 = sphi %s1964_s18, %s2828_s18  }
   0x4   : > { %p26_p0 = scmp.ge.s32.totalorder %s25_s23, 2  ;;  %p1671_p1 = scmp.ge.s32.totalorder %s1932_s22, 1 }
   0x5   : > { %p238_p2 = scmp.lt.s32.totalorder %s1932_s22, 5 }
   0x6   : > { %s2833_s23 = smov (%p26_p0, %s25_s23), 0  ;;  %s2835_s24 = smov (!%p26_p0, %s28_s24), %s1928_s21 }
   0x7   : > { %p239_p3 = pnand %p1671_p1, %p238_p2  ;;  %p30_p4 = scmp.ge.s32.totalorder %s2835_s24, 2 }
   0x9   : > { %s2837_s24 = smov (%p30_p4, %s2835_s24), 0  ;;  %242 = sbr.rel (%p239_p3) target bundleno = 514 (0x202), region = 36 }
   0xe   : > { %v1682_v0 = vld [vmem:[%s2815_s2 + $0x4] sm:$0xf]  ;;  %vm467_vm0 = vcmask 1043456   ;;  %s2002_s27 = sshll.u32 %s1916_s18, 3  ;;  %p294_p5 = scmp.lt.s32.totalorder %s1920_s19, 1  ;;  %vm391_vm1 = vcmask 1046528  }
   0xf   : > { %1847 = vmatpush.msk.msra.mxu1 %vm467_vm0, %v1682_v0  ;;  %1848 = vmatpush.msk.msra.mxu2 %vm467_vm0, %v1682_v0  ;;  %p296_p6 = scmp.lt.s32.totalorder %s2002_s27, 23  ;;  %v1717_v1 = vld [vmem:[%s2815_s2 + $0x8] sm:$0xf]  ;;  %v1735_v2 = vld [vmem:[%s2815_s2 + $0xc] sm:$0xf]  ;;  %vm434_vm2 = vcmask 31744  }
  0x10   : > { %s2015_s7 = scalar_select %p294_p5, %s1920_s19, 1  ;;  %1849 = vmatpush.msk.msra.mxu3 %vm467_vm0, %v1682_v0  ;;  %v366_v3 = vld [vmem:[%s2815_s2] sm:$0xf]  ;;  %v1753_v4 = vld [vmem:[%s2815_s2 + $0x10] sm:$0xf]  ;;  %1683 = vmatpush.msk.msra.mxu0 %vm467_vm0, %v1682_v0  ;;  %vm636_vm3 = vcmask 1045504  }
  0x11   : > { %1718 = vmatpush.msk.msrb.mxu2 %vm467_vm0, %v1717_v1  ;;  %s297_s12 = scalar_select %p296_p6, %s2002_s27, 23  ;;  %1700 = vmatpush.msk.msrb.mxu1 %vm467_vm0, %v366_v3  ;;  %v1789_v36 = vld [vmem:[%s2815_s2 + $0x18] sm:$0xf]  ;;  %v1807_v41 = vld [vmem:[%s2815_s2 + $0x1c] sm:$0xf]  ;;  %vm1381_vm4 = vcmask 64512  }
  0x12   : > { %1736 = vmatpush.msk.msrb.mxu3 %vm467_vm0, %v1735_v2  ;;  %s1851_s13 = smul.u32 72, %s2015_s7  ;;  %1754 = vmatpush.msk.msrb.mxu0 %vm467_vm0, %v1753_v4  ;;  %v1771_v44 = vld [vmem:[%s2815_s2 + $0x14] sm:$0xf]  ;;  %v1825_v50 = vld [vmem:[%s2815_s2 + $0x20] sm:$0xf]  ;;  %p320_p8 = scmp.lt.s32.totalorder %s2002_s27, 15 }
  0x13   : > { %s1850_s14 = smul.u32 3, %s297_s12  ;;  %s1846_s12 = sadd.s32 8, %s2002_s27  ;;  %vm1505_vm5 = vcmask 57344  }
  0x14   : > { %p308_p7 = scmp.lt.s32.totalorder %s1846_s12, 23  ;;  %s2841_s27 = smov (!%p320_p8, %s2002_s27), 15 }
  0x15   : > { %s300_s15 = sadd.s32 %s1851_s13, %s1850_s14  ;;  %s1678_s28 = sshll.u32 %s2015_s7, 5 }
  0x16   : > { %s1673_s16 = sshll.u32 %s300_s15, 3  ;;  %s2839_s12 = smov (!%p308_p7, %s1846_s12), 23 }
  0x17   : > { %s2036_s26 = scalar_lea.vmem %s2813_s0, %s1673_s16  ;;  %s1852_s14 = smul.u32 3, %s2839_s12 }
  0x18   : > { %v2039_v5 = vld [vmem:[%s2036_s26 + $0x30] sm:$0xff]  ;;  %v2042_v6 = vld [vmem:[%s2036_s26 + $0x38] sm:$0xff]  ;;  %v2045_v7 = vld [vmem:[%s2036_s26 + $0x60] sm:$0xff]  ;;  %s1680_s7 = sshll.u32 %s1920_s19, 1 }
  0x19   : > { %v402_v8 = vrot.slane %v2039_v5, 1  ;;  %v403_v9 = vrot.slane %v2042_v6, 1  ;;  %v2050_v10 = vld [vmem:[%s2036_s26 + $0x68] sm:$0xff]  ;;  %v412_v11 = vrot.slane %v2045_v7, 1  ;;  %v2054_v12 = vld [vmem:[%s2036_s26 + $0x90] sm:$0xff]  ;;  %v2057_v13 = vld [vmem:[%s2036_s26 + $0x98] sm:$0xff]  ;;  %s312_s15 = sadd.s32 %s1852_s14, %s1851_s13  ;;  %s329_s11 = sadd.s32 %s1916_s18, %s1680_s7 }
  0x1a   : > { %v413_v14 = vrot.slane %v2050_v10, 1  ;;  %v422_v15 = vrot.slane %v2054_v12, 1  ;;  %v423_v16 = vrot.slane %v2057_v13, 1  ;;  %v2063_v17 = vld [vmem:[%s2036_s26 + $0x40] sm:$0x3]  ;;  %v2075_v21 = vld [vmem:[%s2036_s26 + $0x8] sm:$0xff] }
  0x1b   : > { %v2066_v18 = vld [vmem:[%s2036_s26] sm:$0xff]  ;;  %v2069_v19 = vsel %vm391_vm1, %v402_v8, %v403_v9  ;;  %v2072_v20 = vld [vmem:[%s2036_s26 + $0x70] sm:$0x3]  ;;  %v393_v25 = vrot.slane %v2075_v21, 1  ;;  %v405_v27 = vrot.slane %v2063_v17, 1  ;;  %v2107_v34 = vld [vmem:[%s2036_s26 + $0x48] sm:$0xff] }
  0x1c   : > { %v392_v22 = vrot.slane %v2066_v18, 1  ;;  %1688 = vmatmul.msk.f32.vlgmr.msra.gmra.mxu1 %vm434_vm2, %v2069_v19  ;;  %v2081_v23 = vsel %vm391_vm1, %v412_v11, %v413_v14  ;;  %v2084_v24 = vsel %vm391_vm1, %v422_v15, %v423_v16  ;;  %v2088_v26 = vld [vmem:[%s2036_s26 + $0xa0] sm:$0x3]  ;;  %v2096_v28 = vld [vmem:[%s2036_s26 + $0x10] sm:$0x3]  ;;  %v415_v29 = vrot.slane %v2072_v20, 1 }
  0x1d   : > { %1692 = vmatmul.msk.f32.vlgmr.msra.gmra.mxu2 %vm434_vm2, %v2081_v23  ;;  %1696 = vmatmul.msk.f32.vlgmr.msra.gmra.mxu3 %vm434_vm2, %v2084_v24  ;;  %v425_v31 = vrot.slane %v2088_v26, 1  ;;  %v395_v32 = vrot.slane %v2096_v28, 1  ;;  %v2104_v33 = vsel %vm391_vm1, %v403_v9, %v405_v27  ;;  %v2110_v35 = vld [vmem:[%s2036_s26 + $0x50] sm:$0xff]  ;;  %v2122_v39 = vld [vmem:[%s2036_s26 + $0x78] sm:$0xff]  ;;  %v2125_v40 = vld [vmem:[%s2036_s26 + $0x80] sm:$0xff]  ;;  %v407_v46 = vrot.slane %v2107_v34, 1 }
  0x1e   : > { %v394_v30 = vsel %vm391_vm1, %v392_v22, %v393_v25  ;;  %v2116_v37 = vsel %vm391_vm1, %v413_v14, %v415_v29  ;;  %1790 = vmatpush.msk.msra.mxu2 %vm467_vm0, %v1789_v36  ;;  %v2132_v42 = vld [vmem:[%s2036_s26 + $0xa8] sm:$0xff]  ;;  %v2135_v43 = vld [vmem:[%s2036_s26 + $0xb0] sm:$0xff]  ;;  %1808 = vmatpush.msk.msra.mxu3 %vm467_vm0, %v1807_v41  ;;  %v408_v47 = vrot.slane %v2110_v35, 1  ;;  %v339_v48 = vld [vmem:[%s2036_s26 + $0x18] sm:$0xff]  ;;  %v417_v51 = vrot.slane %v2122_v39, 1  ;;  %s1675_s16 = sshll.u32 %s312_s15, 3 }
  0x1f   : > { %1684 = vmatmul.msk.f32.vlgmr.msra.gmra.mxu0 %vm434_vm2, %v394_v30  ;;  %v2119_v38 = vsel %vm391_vm1, %v423_v16, %v425_v31  ;;  %v396_v45 = vsel %vm391_vm1, %v393_v25, %v395_v32  ;;  %v340_v49 = vld [vmem:[%s2036_s26 + $0x20] sm:$0xff]  ;;  %v418_v52 = vrot.slane %v2125_v40, 1  ;;  %v427_v53 = vrot.slane %v2132_v42, 1  ;;  %1772 = vmatpush.msk.msra.mxu1 %vm467_vm0, %v1771_v44  ;;  %v2172_v60 = vld [vmem:[%s2036_s26 + $0x58] sm:$0x3]  ;;  %s2377_s13 = scalar_lea.vmem %s2814_s1, %s1675_s16  ;;  %p330_p9 = scmp.lt.s32.totalorder %s329_s11, 3 }
  0x20   : > { %v428_v54 = vrot.slane %v2135_v43, 1  ;;  %1826 = vmatpush.msk.msra.mxu0 %vm467_vm0, %v1825_v50  ;;  %v397_v55 = vrot.slane %v339_v48, 1  ;;  %v398_v56 = vrot.slane %v340_v49, 1  ;;  %v2163_v57 = vsel %vm391_vm1, %v407_v46, %v408_v47  ;;  %v2175_v61 = vld [vmem:[%s2036_s26 + $0x88] sm:$0x3] }
  0x21   : > { %v2166_v58 = vsel %vm391_vm1, %v417_v51, %v418_v52  ;;  %v2178_v62 = vld [vmem:[%s2036_s26 + $0xb8] sm:$0x3]  ;;  %v410_v0 = vrot.slane %v2172_v60, 1  ;;  %v341_v1 = vld [vmem:[%s2036_s26 + $0x28] sm:$0x3]  ;;  %v420_v2 = vrot.slane %v2175_v61, 1 }
  0x22   : > { %v2169_v59 = vsel %vm391_vm1, %v427_v53, %v428_v54  ;;  %v399_v63 = vsel %vm391_vm1, %v397_v55, %v398_v56  ;;  %v430_v3 = vrot.slane %v2178_v62, 1  ;;  %v400_v4 = vrot.slane %v341_v1, 1  ;;  %s1677_s26 = sshll.u32 %s2841_s27, 1  ;;  %s2843_s11 = smov (!%p330_p9, %s329_s11), 3 }
  0x23   : > { %v2193_v8 = vsel %vm391_vm1, %v408_v47, %v410_v0  ;;  %v2196_v9 = vsel %vm391_vm1, %v418_v52, %v420_v2  ;;  %v637_v15 = vrot.slane %v2066_v18, 2  ;;  %v638_v16 = vrot.slane %v2075_v21, 2  ;;  %s324_s29 = sadd.s32 %s1678_s28, %s1677_s26  ;;  %s1681_s12 = sshll.u32 %s2843_s11, 1 }
  0x24   : > { %1689 = vmatmul.msk.f32.gmra.mxu1 %vm434_vm2, %v2104_v33  ;;  %v2199_v11 = vsel %vm391_vm1, %v428_v54, %v430_v3  ;;  %v401_v14 = vsel %vm391_vm1, %v398_v56, %v400_v4  ;;  %v640_v25 = vrot.slane %v2096_v28, 2  ;;  %v642_v29 = vrot.slane %v339_v48, 2  ;;  %s1679_s30 = sshll.u32 %s324_s29, 3  ;;  %s2764_s19 = scalar_lea.vmem %s2818_s5, %s1681_s12 }
  0x25   : > { %1693 = vmatmul.msk.f32.gmra.mxu2 %vm434_vm2, %v2116_v37  ;;  %1697 = vmatmul.msk.f32.gmra.mxu3 %vm434_vm2, %v2119_v38  ;;  %v639_v22 = vsel %vm636_vm3, %v637_v15, %v638_v16  ;;  %v643_v30 = vrot.slane %v340_v49, 2  ;;  %v647_v31 = vrot.slane %v2039_v5, 2  ;;  %v648_v32 = vrot.slane %v2042_v6, 2  ;;  %s2630_s27 = scalar_lea.vmem %s2817_s4, %s1679_s30 }
  0x26   : > { %v641_v27 = vsel %vm636_vm3, %v638_v16, %v640_v25  ;;  %v650_v41 = vrot.slane %v2063_v17, 2  ;;  %v653_v46 = vrot.slane %v2110_v35, 2  ;;  %v655_v47 = vrot.slane %v2172_v60, 2 }
  0x27   : > { %1685 = vmatmul.msk.f32.gmra.mxu0 %vm434_vm2, %v396_v45  ;;  %v2247_v36 = vsel %vm636_vm3, %v647_v31, %v648_v32  ;;  %v652_v45 = vrot.slane %v2107_v34, 2  ;;  %v658_v50 = vrot.slane %v2050_v10, 2  ;;  %v660_v52 = vrot.slane %v2072_v20, 2 }
  0x28   : > { %v2259_v44 = vsel %vm636_vm3, %v648_v32, %v650_v41  ;;  %v662_v54 = vrot.slane %v2122_v39, 2  ;;  %v663_v55 = vrot.slane %v2125_v40, 2  ;;  %v665_v56 = vrot.slane %v2175_v61, 2 }
  0x29   : > { %v2272_v17 = vsel %vm636_vm3, %v652_v45, %v653_v46  ;;  %v2309_v53 = vsel %vm636_vm3, %v658_v50, %v660_v52  ;;  %v667_v61 = vrot.slane %v2054_v12, 2  ;;  %v670_v3 = vrot.slane %v2088_v26, 2  ;;  %v2384_v26 = vld [vmem:[%s2377_s13 + $0x8] sm:$0xff] }
  0x2a   : > { %v2322_v20 = vsel %vm636_vm3, %v662_v54, %v663_v55  ;;  %v2335_v60 = vsel %vm636_vm3, %v663_v55, %v665_v56  ;;  %v672_v25 = vrot.slane %v2132_v42, 2  ;;  %v889_v32 = vrot.slane %v2384_v26, 1 }
  0x2c   : > { %1690 = vmatmul.msk.f32.gmra.mxu1 %vm434_vm2, %v2163_v57 }
  0x2d   : > { %1694 = vmatmul.msk.f32.gmra.mxu2 %vm434_vm2, %v2166_v58  ;;  %1698 = vmatmul.msk.f32.gmra.mxu3 %vm434_vm2, %v2169_v59 }
  0x2f   : > { %1686 = vmatmul.msk.f32.gmra.mxu0 %vm434_vm2, %v399_v63 }
  0x34   : > { %1691 = vmatmul.msk.f32.gmra.mxu1 %vm434_vm2, %v2193_v8 }
  0x35   : > { %1695 = vmatmul.msk.f32.gmra.mxu2 %vm434_vm2, %v2196_v9  ;;  %1699 = vmatmul.msk.f32.gmra.mxu3 %vm434_vm2, %v2199_v11 }
  0x37   : > { %1687 = vmatmul.msk.f32.gmra.mxu0 %vm434_vm2, %v401_v14 }
  0x3c   : > { %1701 = vmatmul.msk.f32.vlgmr.msrb.gmra.mxu1 %vm434_vm2, %v2066_v18  ;;  %v2225_v18 = vsel %vm636_vm3, %v642_v29, %v643_v30  ;;  %v2389_v29 = vld [vmem:[%s2377_s13] sm:$0xff] }
  0x3d   : > { %1719 = vmatmul.msk.f32.vlgmr.msrb.gmra.mxu2 %vm434_vm2, %v639_v22  ;;  %1737 = vmatmul.msk.f32.vlgmr.msrb.gmra.mxu3 %vm434_vm2, %v339_v48  ;;  %v888_v31 = vrot.slane %v2389_v29, 1 }
  0x3f   : > { %1755 = vmatmul.msk.f32.vlgmr.msrb.gmra.mxu0 %vm434_vm2, %v399_v63  ;;  %v668_v63 = vrot.slane %v2057_v13, 2 }
  0x41   : > { %v2370_v16 = vsel %vm636_vm3, %v668_v63, %v670_v3 }
  0x44   : > { %1702 = vmatmul.msk.f32.gmra.mxu1 %vm434_vm2, %v2075_v21  ;;  %v645_v21 = vrot.slane %v341_v1, 2  ;;  %v2350_v1 = vsel %vm636_vm3, %v667_v61, %v668_v63 }
  0x45   : > { %1720 = vmatmul.msk.f32.gmra.mxu2 %vm434_vm2, %v641_v27  ;;  %1738 = vmatmul.msk.f32.gmra.mxu3 %vm434_vm2, %v340_v49  ;;  %v673_v27 = vrot.slane %v2135_v43, 2 }
  0x46   : > { %v2235_v28 = vsel %vm636_vm3, %v643_v30, %v645_v21 }
  0x47   : > { %1756 = vmatmul.msk.f32.gmra.mxu0 %vm434_vm2, %v401_v14  ;;  %v2402_v45 = vsel %vm636_vm3, %v672_v25, %v673_v27 }
  0x4c   : > { %1703 = vmatmul.msk.f32.gmra.mxu1 %vm434_vm2, %v339_v48  ;;  %v2284_v48 = vsel %vm636_vm3, %v653_v46, %v655_v47  ;;  %v2407_v47 = vsel %vm391_vm1, %v888_v31, %v889_v32 }
  0x4d   : > { %1721 = vmatmul.msk.f32.gmra.mxu2 %vm434_vm2, %v2225_v18  ;;  %1739 = vmatmul.msk.f32.gmra.mxu3 %vm434_vm2, %v2039_v5 }
  0x4f   : > { %1757 = vmatmul.msk.f32.gmra.mxu0 %vm434_vm2, %v2069_v19 }
  0x54   : > { %1704 = vmatmul.msk.f32.gmra.mxu1 %vm434_vm2, %v340_v49  ;;  %v657_v49 = vrot.slane %v2045_v7, 2 }
  0x55   : > { %1722 = vmatmul.msk.f32.gmra.mxu2 %vm434_vm2, %v2235_v28  ;;  %1740 = vmatmul.msk.f32.gmra.mxu3 %vm434_vm2, %v2042_v6 }
  0x56   : > { %v2297_v51 = vsel %vm636_vm3, %v657_v49, %v658_v50  ;;  %v2414_v49 = vld [vmem:[%s2377_s13 + $0x10] sm:$0x3]  ;;  %v675_v50 = vrot.slane %v2178_v62, 2 }
  0x57   : > { %1758 = vmatmul.msk.f32.gmra.mxu0 %vm434_vm2, %v2104_v33  ;;  %v891_v55 = vrot.slane %v2414_v49, 1 }
  0x58   : > { %v2427_v61 = vsel %vm636_vm3, %v673_v27, %v675_v50 }
  0x59   : > { %v2432_v62 = vsel %vm391_vm1, %v889_v32, %v891_v55 }
  0x5a   : > { %2822 = vst [vmem:[#allocation4_spill] sm:$0xff] %v2432_v62 }
  0x5c   : > { %1705 = vmatmul.msk.f32.gmra.mxu1 %vm434_vm2, %v2039_v5 }
  0x5d   : > { %1723 = vmatmul.msk.f32.gmra.mxu2 %vm434_vm2, %v2247_v36  ;;  %1741 = vmatmul.msk.f32.gmra.mxu3 %vm434_vm2, %v2107_v34 }
  0x5f   : > { %1759 = vmatmul.msk.f32.gmra.mxu0 %vm434_vm2, %v2163_v57 }
  0x64   : > { %1706 = vmatmul.msk.f32.gmra.mxu1 %vm434_vm2, %v2042_v6 }
  0x65   : > { %1724 = vmatmul.msk.f32.gmra.mxu2 %vm434_vm2, %v2259_v44  ;;  %1742 = vmatmul.msk.f32.gmra.mxu3 %vm434_vm2, %v2110_v35 }
  0x67   : > { %1760 = vmatmul.msk.f32.gmra.mxu0 %vm434_vm2, %v2193_v8 }
  0x6c   : > { %1707 = vmatmul.msk.f32.gmra.mxu1 %vm434_vm2, %v2107_v34 }
  0x6d   : > { %1725 = vmatmul.msk.f32.gmra.mxu2 %vm434_vm2, %v2272_v17  ;;  %1743 = vmatmul.msk.f32.gmra.mxu3 %vm434_vm2, %v2045_v7 }
  0x6f   : > { %1761 = vmatmul.msk.f32.gmra.mxu0 %vm434_vm2, %v2081_v23 }
  0x74   : > { %1708 = vmatmul.msk.f32.gmra.mxu1 %vm434_vm2, %v2110_v35 }
  0x75   : > { %1726 = vmatmul.msk.f32.gmra.mxu2 %vm434_vm2, %v2284_v48  ;;  %1744 = vmatmul.msk.f32.gmra.mxu3 %vm434_vm2, %v2050_v10 }
  0x77   : > { %1762 = vmatmul.msk.f32.gmra.mxu0 %vm434_vm2, %v2116_v37 }
  0x7c   : > { %1709 = vmatmul.msk.f32.gmra.mxu1 %vm434_vm2, %v2045_v7 }
  0x7d   : > { %1727 = vmatmul.msk.f32.gmra.mxu2 %vm434_vm2, %v2297_v51  ;;  %1745 = vmatmul.msk.f32.gmra.mxu3 %vm434_vm2, %v2122_v39 }
  0x7f   : > { %1763 = vmatmul.msk.f32.gmra.mxu0 %vm434_vm2, %v2166_v58 }
  0x84   : > { %1710 = vmatmul.msk.f32.gmra.mxu1 %vm434_vm2, %v2050_v10 }
  0x85   : > { %1728 = vmatmul.msk.f32.gmra.mxu2 %vm434_vm2, %v2309_v53  ;;  %1746 = vmatmul.msk.f32.gmra.mxu3 %vm434_vm2, %v2125_v40 }
  0x87   : > { %1764 = vmatmul.msk.f32.gmra.mxu0 %vm434_vm2, %v2196_v9 }
  0x8c   : > { %1711 = vmatmul.msk.f32.gmra.mxu1 %vm434_vm2, %v2122_v39 }
  0x8d   : > { %1729 = vmatmul.msk.f32.gmra.mxu2 %vm434_vm2, %v2322_v20  ;;  %1747 = vmatmul.msk.f32.gmra.mxu3 %vm434_vm2, %v2054_v12 }
  0x8f   : > { %1765 = vmatmul.msk.f32.gmra.mxu0 %vm434_vm2, %v2084_v24 }
  0x94   : > { %1712 = vmatmul.msk.f32.gmra.mxu1 %vm434_vm2, %v2125_v40 }
  0x95   : > { %1730 = vmatmul.msk.f32.gmra.mxu2 %vm434_vm2, %v2335_v60  ;;  %1748 = vmatmul.msk.f32.gmra.mxu3 %vm434_vm2, %v2057_v13 }
  0x97   : > { %1766 = vmatmul.msk.f32.gmra.mxu0 %vm434_vm2, %v2119_v38 }
  0x99   : > { %v2347_v0 = vpop.f32.mrf.mxu1 }
  0x9c   : > { %1713 = vmatmul.msk.f32.gmra.mxu1 %vm434_vm2, %v2054_v12  ;;  %v488_v2 = vpop.f32.mrf.mxu0 }
  0x9d   : > { %1731 = vmatmul.msk.f32.gmra.mxu2 %vm434_vm2, %v2350_v1  ;;  %1749 = vmatmul.msk.f32.gmra.mxu3 %vm434_vm2, %v2132_v42 }
  0x9f   : > { %1767 = vmatmul.msk.f32.gmra.mxu0 %vm434_vm2, %v2169_v59 }
  0xa0   : > { %v2363_v4 = vpop.f32.mrf.mxu2  ;;  %v2365_v14 = vpop.f32.mrf.mxu3 }
  0xa1   : > { %v2367_v15 = vpop.f32.mrf.mxu1 }
  0xa4   : > { %1714 = vmatmul.msk.f32.gmra.mxu1 %vm434_vm2, %v2057_v13  ;;  %v491_v22 = vpop.f32.mrf.mxu0 }
  0xa5   : > { %1732 = vmatmul.msk.f32.gmra.mxu2 %vm434_vm2, %v2370_v16  ;;  %1750 = vmatmul.msk.f32.gmra.mxu3 %vm434_vm2, %v2135_v43 }
  0xa7   : > { %1768 = vmatmul.msk.f32.gmra.mxu0 %vm434_vm2, %v2199_v11 }
  0xa8   : > { %v2393_v30 = vpop.f32.mrf.mxu2  ;;  %v2395_v21 = vpop.f32.mrf.mxu3 }
  0xa9   : > { %2820 = vst [vmem:[#allocation2_spill] sm:$0xff] %v2395_v21  ;;  %v2399_v41 = vpop.f32.mrf.mxu1 }
  0xac   : > { %1715 = vmatmul.msk.f32.gmra.mxu1 %vm434_vm2, %v2132_v42  ;;  %v494_v46 = vpop.f32.mrf.mxu0 }
  0xad   : > { %1733 = vmatmul.msk.f32.gmra.mxu2 %vm434_vm2, %v2402_v45  ;;  %1751 = vmatmul.msk.f32.gmra.mxu3 %vm434_vm2, %v2389_v29 }
  0xaf   : > { %1769 = vmatmul.msk.f32.gmra.mxu0 %vm434_vm2, %v2407_v47 }
  0xb0   : > { %v2419_v52 = vpop.f32.mrf.mxu2  ;;  %v2421_v54 = vpop.f32.mrf.mxu3 }
  0xb1   : > { %2821 = vst [vmem:[#allocation3_spill] sm:$0xff] %v2421_v54  ;;  %v2424_v56 = vpop.f32.mrf.mxu1 }
  0xb4   : > { %1716 = vmatmul.msk.f32.gmra.mxu1 %vm434_vm2, %v2135_v43  ;;  %v497_v63 = vpop.f32.mrf.mxu0 }
  0xb5   : > { %1734 = vmatmul.msk.f32.gmra.mxu2 %vm434_vm2, %v2427_v61  ;;  %1752 = vmatmul.msk.f32.gmra.mxu3 %vm434_vm2, %v2384_v26 }
  0xb7   : > { %1770 = vmatmul.msk.f32.gmra.mxu0 %vm434_vm2, %v2432_v62 }
  0xb8   : > { %v2440_v3 = vpop.f32.mrf.mxu2  ;;  %v2442_v25 = vpop.f32.mrf.mxu3 }
  0xb9   : > { %2823 = vst [vmem:[#allocation5_spill] sm:$0xff] %v2442_v25  ;;  %v588_v27 = vpop.f32.mrf.mxu1 }
  0xba   : > { %v589_v32 = vadd.f32 %v588_v27, %v488_v2 }
  0xbc   : > { %1773 = vmatmul.msk.f32.vlgmr.msra.gmra.mxu1 %vm434_vm2, %v2225_v18  ;;  %v919_v31 = vpop.f32.mrf.mxu0 }
  0xbd   : > { %1791 = vmatmul.msk.f32.vlgmr.msra.gmra.mxu2 %vm434_vm2, %v2039_v5  ;;  %1809 = vmatmul.msk.f32.vlgmr.msra.gmra.mxu3 %vm434_vm2, %v2069_v19 }
  0xbf   : > { %1827 = vmatmul.msk.f32.vlgmr.msra.gmra.mxu0 %vm434_vm2, %v2247_v36 }
  0xc0   : > { %v731_v50 = vpop.f32.mrf.mxu2  ;;  %v823_v55 = vpop.f32.mrf.mxu3 }
  0xc1   : > { %v779_v54 = vadd.f32 %v731_v50, %v589_v32  ;;  %v591_v21 = vpop.f32.mrf.mxu1 }
  0xc2   : > { %v592_v5 = vadd.f32 %v591_v21, %v491_v22 }
  0xc3   : > { %v871_v25 = vadd.f32 %v823_v55, %v779_v54 }
  0xc4   : > { %1774 = vmatmul.msk.f32.gmra.mxu1 %vm434_vm2, %v2235_v28  ;;  %v922_v18 = vpop.f32.mrf.mxu0 }
  0xc5   : > { %v2454_v62 = vadd.f32 %v919_v31, %v871_v25  ;;  %1792 = vmatmul.msk.f32.gmra.mxu2 %vm434_vm2, %v2042_v6  ;;  %1810 = vmatmul.msk.f32.gmra.mxu3 %vm434_vm2, %v2104_v33 }
  0xc7   : > { %1828 = vmatmul.msk.f32.gmra.mxu0 %vm434_vm2, %v2259_v44 }
  0xc8   : > { %v734_v19 = vpop.f32.mrf.mxu2  ;;  %v826_v2 = vpop.f32.mrf.mxu3 }
  0xc9   : > { %v780_v27 = vadd.f32 %v734_v19, %v592_v5  ;;  %v594_v54 = vpop.f32.mrf.mxu1 }
  0xca   : > { %v595_v6 = vadd.f32 %v594_v54, %v494_v46 }
  0xcb   : > { %v872_v32 = vadd.f32 %v826_v2, %v780_v27 }
  0xcc   : > { %1775 = vmatmul.msk.f32.gmra.mxu1 %vm434_vm2, %v2247_v36  ;;  %v925_v28 = vpop.f32.mrf.mxu0 }
  0xcd   : > { %v2464_v25 = vadd.f32 %v922_v18, %v872_v32  ;;  %1793 = vmatmul.msk.f32.gmra.mxu2 %vm434_vm2, %v2107_v34  ;;  %1811 = vmatmul.msk.f32.gmra.mxu3 %vm434_vm2, %v2163_v57 }
  0xcf   : > { %1829 = vmatmul.msk.f32.gmra.mxu0 %vm434_vm2, %v2272_v17 }
  0xd0   : > { %v737_v33 = vpop.f32.mrf.mxu2  ;;  %v829_v22 = vpop.f32.mrf.mxu3 }
  0xd1   : > { %v781_v21 = vadd.f32 %v737_v33, %v595_v6  ;;  %v597_v31 = vpop.f32.mrf.mxu1 }
  0xd2   : > { %v598_v34 = vadd.f32 %v597_v31, %v497_v63 }
  0xd3   : > { %v873_v50 = vadd.f32 %v829_v22, %v781_v21 }
  0xd4   : > { %1776 = vmatmul.msk.f32.gmra.mxu1 %vm434_vm2, %v2259_v44  ;;  %v928_v36 = vpop.f32.mrf.mxu0 }
  0xd5   : > { %v2474_v55 = vadd.f32 %v925_v28, %v873_v50  ;;  %1794 = vmatmul.msk.f32.gmra.mxu2 %vm434_vm2, %v2110_v35  ;;  %1812 = vmatmul.msk.f32.gmra.mxu3 %vm434_vm2, %v2193_v8 }
  0xd7   : > { %1830 = vmatmul.msk.f32.gmra.mxu0 %vm434_vm2, %v2284_v48 }
  0xd8   : > { %v740_v57 = vpop.f32.mrf.mxu2  ;;  %v832_v46 = vpop.f32.mrf.mxu3 }
  0xd9   : > { %v782_v18 = vadd.f32 %v740_v57, %v598_v34  ;;  %v600_v5 = vpop.f32.mrf.mxu1 }
  0xda   : > { %v601_v35 = vadd.f32 %v600_v5, %v2347_v0 }
  0xdb   : > { %v874_v19 = vadd.f32 %v832_v46, %v782_v18 }
  0xdc   : > { %1777 = vmatmul.msk.f32.gmra.mxu1 %vm434_vm2, %v2272_v17  ;;  %v931_v44 = vpop.f32.mrf.mxu0 }
  0xdd   : > { %v2484_v2 = vadd.f32 %v928_v36, %v874_v19  ;;  %1795 = vmatmul.msk.f32.gmra.mxu2 %vm434_vm2, %v2045_v7  ;;  %1813 = vmatmul.msk.f32.gmra.mxu3 %vm434_vm2, %v2081_v23 }
  0xdf   : > { %1831 = vmatmul.msk.f32.gmra.mxu0 %vm434_vm2, %v2297_v51 }
  0xe0   : > { %v743_v8 = vpop.f32.mrf.mxu2  ;;  %v835_v63 = vpop.f32.mrf.mxu3 }
  0xe1   : > { %v783_v27 = vadd.f32 %v743_v8, %v601_v35  ;;  %v603_v54 = vpop.f32.mrf.mxu1 }
  0xe2   : > { %v604_v7 = vadd.f32 %v603_v54, %v2367_v15 }
  0xe3   : > { %v875_v32 = vadd.f32 %v835_v63, %v783_v27 }
  0xe4   : > { %1778 = vmatmul.msk.f32.gmra.mxu1 %vm434_vm2, %v2284_v48  ;;  %v934_v17 = vpop.f32.mrf.mxu0 }
  0xe5   : > { %v2495_v28 = vadd.f32 %v931_v44, %v875_v32  ;;  %1796 = vmatmul.msk.f32.gmra.mxu2 %vm434_vm2, %v2050_v10  ;;  %1814 = vmatmul.msk.f32.gmra.mxu3 %vm434_vm2, %v2116_v37 }
  0xe7   : > { %1832 = vmatmul.msk.f32.gmra.mxu0 %vm434_vm2, %v2309_v53 }
  0xe8   : > { %v746_v23 = vpop.f32.mrf.mxu2  ;;  %v838_v0 = vpop.f32.mrf.mxu3 }
  0xe9   : > { %v784_v6 = vadd.f32 %v746_v23, %v604_v7  ;;  %v606_v33 = vpop.f32.mrf.mxu1 }
  0xea   : > { %v607_v10 = vadd.f32 %v606_v33, %v2399_v41 }
  0xeb   : > { %v876_v22 = vadd.f32 %v838_v0, %v784_v6 }
  0xec   : > { %1779 = vmatmul.msk.f32.gmra.mxu1 %vm434_vm2, %v2297_v51  ;;  %v937_v48 = vpop.f32.mrf.mxu0 }
  0xed   : > { %v2506_v21 = vadd.f32 %v934_v17, %v876_v22  ;;  %1797 = vmatmul.msk.f32.gmra.mxu2 %vm434_vm2, %v2122_v39  ;;  %1815 = vmatmul.msk.f32.gmra.mxu3 %vm434_vm2, %v2166_v58 }
  0xef   : > { %1833 = vmatmul.msk.f32.gmra.mxu0 %vm434_vm2, %v2322_v20 }
  0xf0   : > { %v749_v37 = vpop.f32.mrf.mxu2  ;;  %v841_v15 = vpop.f32.mrf.mxu3 }
  0xf1   : > { %v785_v31 = vadd.f32 %v749_v37, %v607_v10  ;;  %v609_v50 = vpop.f32.mrf.mxu1 }
  0xf2   : > { %v610_v39 = vadd.f32 %v609_v50, %v2424_v56 }
  0xf3   : > { %v877_v36 = vadd.f32 %v841_v15, %v785_v31  ;;  %v986_v31 = vrot.slane %v2414_v49, 2 }
  0xf4   : > { %1780 = vmatmul.msk.f32.gmra.mxu1 %vm434_vm2, %v2309_v53  ;;  %v940_v51 = vpop.f32.mrf.mxu0 }
  0xf5   : > { %v2517_v34 = vadd.f32 %v937_v48, %v877_v36  ;;  %1798 = vmatmul.msk.f32.gmra.mxu2 %vm434_vm2, %v2125_v40  ;;  %1816 = vmatmul.msk.f32.gmra.mxu3 %vm434_vm2, %v2196_v9 }
  0xf7   : > { %1834 = vmatmul.msk.f32.gmra.mxu0 %vm434_vm2, %v2335_v60 }
  0xf8   : > { %v752_v58 = vpop.f32.mrf.mxu2  ;;  %v844_v41 = vpop.f32.mrf.mxu3 }
  0xf9   : > { %v786_v57 = vadd.f32 %v752_v58, %v610_v39  ;;  %v612_v46 = vpop.f32.mrf.mxu1  ;;  %v364_v39 = vld [vmem:[%s2377_s13 + $0x20] sm:$0xff] }
  0xfa   : > { %v613_v40 = vadd.f32 %v612_v46, %v2363_v4 }
  0xfb   : > { %v878_v18 = vadd.f32 %v844_v41, %v786_v57  ;;  %v1172_v41 = vrot.slane %v364_v39, 1  ;;  %v2825_v57 = vld [vmem:[#allocation2_spill] sm:$0xff] }
  0xfc   : > { %1781 = vmatmul.msk.f32.gmra.mxu1 %vm434_vm2, %v2322_v20  ;;  %v943_v53 = vpop.f32.mrf.mxu0 }
  0xfd   : > { %v2528_v5 = vadd.f32 %v940_v51, %v878_v18  ;;  %1799 = vmatmul.msk.f32.gmra.mxu2 %vm434_vm2, %v2054_v12  ;;  %1817 = vmatmul.msk.f32.gmra.mxu3 %vm434_vm2, %v2084_v24  ;;  %v363_v51 = vld [vmem:[%s2377_s13 + $0x18] sm:$0xff] }
  0xfe   : > { %v1171_v49 = vrot.slane %v363_v51, 1 }
  0xff   : > { %1835 = vmatmul.msk.f32.gmra.mxu0 %vm434_vm2, %v2350_v1 }
 0x100   : > { %v755_v9 = vpop.f32.mrf.mxu2  ;;  %v847_v56 = vpop.f32.mrf.mxu3 }
 0x101   : > { %v787_v19 = vadd.f32 %v755_v9, %v613_v40  ;;  %v615_v44 = vpop.f32.mrf.mxu1  ;;  %v1267_v40 = vrot.slane %v364_v39, 2 }
 0x102   : > { %v616_v12 = vadd.f32 %v615_v44, %v2393_v30 }
 0x103   : > { %v879_v35 = vadd.f32 %v847_v56, %v787_v19  ;;  %v1173_v19 = vsel %vm391_vm1, %v1171_v49, %v1172_v41 }
 0x104   : > { %1782 = vmatmul.msk.f32.gmra.mxu1 %vm434_vm2, %v2335_v60  ;;  %v946_v20 = vpop.f32.mrf.mxu0 }
 0x105   : > { %v2539_v8 = vadd.f32 %v943_v53, %v879_v35  ;;  %1800 = vmatmul.msk.f32.gmra.mxu2 %vm434_vm2, %v2057_v13  ;;  %1818 = vmatmul.msk.f32.gmra.mxu3 %vm434_vm2, %v2119_v38  ;;  %v1266_v53 = vrot.slane %v363_v51, 2  ;;  %v365_v35 = vld [vmem:[%s2377_s13 + $0x28] sm:$0x3] }
 0x107   : > { %1836 = vmatmul.msk.f32.gmra.mxu0 %vm434_vm2, %v2370_v16 }
 0x108   : > { %v758_v24 = vpop.f32.mrf.mxu2  ;;  %v850_v4 = vpop.f32.mrf.mxu3 }
 0x109   : > { %v788_v63 = vadd.f32 %v758_v24, %v616_v12  ;;  %v618_v27 = vpop.f32.mrf.mxu1  ;;  %v1174_v24 = vrot.slane %v365_v35, 1 }
 0x10a   : > { %v619_v13 = vadd.f32 %v618_v27, %v2419_v52  ;;  %v984_v52 = vrot.slane %v2384_v26, 2 }
 0x10b   : > { %v880_v54 = vadd.f32 %v850_v4, %v788_v63  ;;  %v2826_v4 = vld [vmem:[#allocation3_spill] sm:$0xff] }
 0x10c   : > { %1783 = vmatmul.msk.f32.gmra.mxu1 %vm434_vm2, %v2350_v1  ;;  %v949_v60 = vpop.f32.mrf.mxu0  ;;  %v987_v58 = vsel %vm636_vm3, %v984_v52, %v986_v31 }
 0x10d   : > { %v2550_v32 = vadd.f32 %v946_v20, %v880_v54  ;;  %1801 = vmatmul.msk.f32.gmra.mxu2 %vm434_vm2, %v2132_v42  ;;  %1819 = vmatmul.msk.f32.gmra.mxu3 %vm434_vm2, %v2169_v59  ;;  %v983_v59 = vrot.slane %v2389_v29, 2  ;;  %v1268_v20 = vsel %vm636_vm3, %v1266_v53, %v1267_v40 }
 0x10f   : > { %1837 = vmatmul.msk.f32.gmra.mxu0 %vm434_vm2, %v2402_v45 }
 0x110   : > { %v761_v38 = vpop.f32.mrf.mxu2  ;;  %v853_v30 = vpop.f32.mrf.mxu3 }
 0x111   : > { %v789_v17 = vadd.f32 %v761_v38, %v619_v13  ;;  %v621_v7 = vpop.f32.mrf.mxu1 }
 0x112   : > { %v622_v42 = vadd.f32 %v621_v7, %v2440_v3 }
 0x113   : > { %v881_v23 = vadd.f32 %v853_v30, %v789_v17  ;;  %v1175_v30 = vsel %vm391_vm1, %v1172_v41, %v1174_v24 }
 0x114   : > { %1784 = vmatmul.msk.f32.gmra.mxu1 %vm434_vm2, %v2370_v16  ;;  %v952_v1 = vpop.f32.mrf.mxu0 }
 0x115   : > { %v2561_v0 = vadd.f32 %v949_v60, %v881_v23  ;;  %1802 = vmatmul.msk.f32.gmra.mxu2 %vm434_vm2, %v2135_v43  ;;  %1820 = vmatmul.msk.f32.gmra.mxu3 %vm434_vm2, %v2199_v11  ;;  %v985_v11 = vsel %vm636_vm3, %v983_v59, %v984_v52  ;;  %v1269_v60 = vrot.slane %v365_v35, 2 }
 0x117   : > { %1838 = vmatmul.msk.f32.gmra.mxu0 %vm434_vm2, %v2427_v61  ;;  %v1270_v23 = vsel %vm636_vm3, %v1267_v40, %v1269_v60 }
 0x118   : > { %v764_v6 = vpop.f32.mrf.mxu2  ;;  %v856_v16 = vpop.f32.mrf.mxu3 }
 0x119   : > { %v790_v33 = vadd.f32 %v764_v6, %v622_v42  ;;  %v624_v22 = vpop.f32.mrf.mxu1  ;;  %v2827_v42 = vld [vmem:[#allocation5_spill] sm:$0xff] }
 0x11a   : > { %v625_v10 = vadd.f32 %v624_v22, %v2365_v14  ;;  %v2824_v14 = vld [vmem:[#allocation4_spill] sm:$0xff] }
 0x11b   : > { %v882_v48 = vadd.f32 %v856_v16, %v790_v33 }
 0x11c   : > { %1785 = vmatmul.msk.f32.gmra.mxu1 %vm434_vm2, %v2402_v45  ;;  %v955_v43 = vpop.f32.mrf.mxu0 }
 0x11d   : > { %v2575_v3 = vadd.f32 %v952_v1, %v882_v48  ;;  %1803 = vmatmul.msk.f32.gmra.mxu2 %vm434_vm2, %v2389_v29  ;;  %1821 = vmatmul.msk.f32.gmra.mxu3 %vm434_vm2, %v2407_v47 }
 0x11f   : > { %1839 = vmatmul.msk.f32.gmra.mxu0 %vm434_vm2, %v985_v11 }
 0x120   : > { %v767_v37 = vpop.f32.mrf.mxu2  ;;  %v859_v15 = vpop.f32.mrf.mxu3 }
 0x121   : > { %v791_v45 = vadd.f32 %v767_v37, %v625_v10  ;;  %v627_v50 = vpop.f32.mrf.mxu1 }
 0x122   : > { %v628_v46 = vadd.f32 %v627_v50, %v2825_v57  ;;  %v2625_v50 = vld [vmem:[%s2816_s3] ss:$0 sm:$0xff] }
 0x123   : > { %v883_v36 = vadd.f32 %v859_v15, %v791_v45 }
 0x124   : > { %1786 = vmatmul.msk.f32.gmra.mxu1 %vm434_vm2, %v2427_v61  ;;  %v958_v29 = vpop.f32.mrf.mxu0 }
 0x125   : > { %v2589_v47 = vadd.f32 %v955_v43, %v883_v36  ;;  %1804 = vmatmul.msk.f32.gmra.mxu2 %vm434_vm2, %v2384_v26  ;;  %1822 = vmatmul.msk.f32.gmra.mxu3 %vm434_vm2, %v2824_v14 }
 0x127   : > { %1840 = vmatmul.msk.f32.gmra.mxu0 %vm434_vm2, %v987_v58 }
 0x128   : > { %v770_v18 = vpop.f32.mrf.mxu2  ;;  %v862_v61 = vpop.f32.mrf.mxu3 }
 0x129   : > { %v792_v9 = vadd.f32 %v770_v18, %v628_v46  ;;  %v630_v56 = vpop.f32.mrf.mxu1 }
 0x12a   : > { %v631_v63 = vadd.f32 %v630_v56, %v2826_v4 }
 0x12b   : > { %v884_v44 = vadd.f32 %v862_v61, %v792_v9 }
 0x12c   : > { %1787 = vmatmul.msk.f32.gmra.mxu1 %vm434_vm2, %v985_v11  ;;  %v961_v26 = vpop.f32.mrf.mxu0 }
 0x12d   : > { %v2601_v12 = vadd.f32 %v958_v29, %v884_v44  ;;  %1805 = vmatmul.msk.f32.gmra.mxu2 %vm434_vm2, %v363_v51  ;;  %1823 = vmatmul.msk.f32.gmra.mxu3 %vm434_vm2, %v1173_v19 }
 0x12f   : > { %1841 = vmatmul.msk.f32.gmra.mxu0 %vm434_vm2, %v1268_v20 }
 0x130   : > { %v773_v27 = vpop.f32.mrf.mxu2  ;;  %v865_v54 = vpop.f32.mrf.mxu3 }
 0x131   : > { %v793_v13 = vadd.f32 %v773_v27, %v631_v63  ;;  %v633_v38 = vpop.f32.mrf.mxu1 }
 0x132   : > { %v634_v59 = vadd.f32 %v633_v38, %v2827_v42 }
 0x133   : > { %v885_v17 = vadd.f32 %v865_v54, %v793_v13 }
 0x134   : > { %1788 = vmatmul.msk.f32.gmra.mxu1 %vm434_vm2, %v987_v58  ;;  %v964_v7 = vpop.f32.mrf.mxu0 }
 0x135   : > { %v2610_v1 = vadd.f32 %v961_v26, %v885_v17  ;;  %1806 = vmatmul.msk.f32.gmra.mxu2 %vm434_vm2, %v364_v39  ;;  %1824 = vmatmul.msk.f32.gmra.mxu3 %vm434_vm2, %v1175_v30 }
 0x137   : > { %1842 = vmatmul.msk.f32.gmra.mxu0 %vm434_vm2, %v1270_v23 }
 0x138   : > { %v776_v52 = vpop.f32.mrf.mxu2  ;;  %v868_v6 = vpop.f32.mrf.mxu3 }
 0x139   : > { %v794_v16 = vadd.f32 %v776_v52, %v634_v59  ;;  %v1014_v33 = vpop.f32.mrf.mxu1 }
 0x13a   : > { %v1062_v11 = vadd.f32 %v1014_v33, %v2454_v62 }
 0x13b   : > { %v886_v22 = vadd.f32 %v868_v6, %v794_v16 }
 0x13c   : > { %v1297_v48 = vpop.f32.mrf.mxu0 }
 0x13d   : > { %v2618_v43 = vadd.f32 %v964_v7, %v886_v22 }
 0x140   : > { %v1106_v10 = vpop.f32.mrf.mxu2  ;;  %v1202_v37 = vpop.f32.mrf.mxu3 }
 0x141   : > { %v1154_v15 = vadd.f32 %v1106_v10, %v1062_v11  ;;  %v1017_v31 = vpop.f32.mrf.mxu1 }
 0x142   : > { %v1063_v62 = vadd.f32 %v1017_v31, %v2464_v25 }
 0x143   : > { %v1250_v45 = vadd.f32 %v1202_v37, %v1154_v15 }
 0x144   : > { %v1300_v36 = vpop.f32.mrf.mxu0 }
 0x145   : > { %v1345_v51 = vadd.f32 %v1297_v48, %v1250_v45 }
 0x147   : > { %v2634_v39 = vadd.f32 %v2625_v50, %v1345_v51 }
 0x148   : > { %v1109_v29 = vpop.f32.mrf.mxu2  ;;  %v1205_v58 = vpop.f32.mrf.mxu3 }
 0x149   : > { %1382 = vst.msk [vmem:[%s2630_s27] sm:$0xff] %vm1381_vm4, %v2634_v39  ;;  %v1155_v14 = vadd.f32 %v1109_v29, %v1063_v62  ;;  %v1020_v49 = vpop.f32.mrf.mxu1 }
 0x14a   : > { %v1064_v18 = vadd.f32 %v1020_v49, %v2474_v55 }
 0x14b   : > { %v1251_v41 = vadd.f32 %v1205_v58, %v1155_v14 }
 0x14c   : > { %v1303_v57 = vpop.f32.mrf.mxu0 }
 0x14d   : > { %v1346_v46 = vadd.f32 %v1300_v36, %v1251_v41 }
 0x14f   : > { %v2641_v61 = vadd.f32 %v2625_v50, %v1346_v46 }
 0x150   : > { %v1112_v25 = vpop.f32.mrf.mxu2  ;;  %v1208_v53 = vpop.f32.mrf.mxu3 }
 0x151   : > { %1383 = vst.msk [vmem:[%s2630_s27 + $0x8] sm:$0xff] %vm1381_vm4, %v2641_v61  ;;  %v1156_v40 = vadd.f32 %v1112_v25, %v1064_v18  ;;  %v1023_v9 = vpop.f32.mrf.mxu1 }
 0x152   : > { %v1065_v35 = vadd.f32 %v1023_v9, %v2484_v2 }
 0x153   : > { %v1252_v56 = vadd.f32 %v1208_v53, %v1156_v40 }
 0x154   : > { %v1306_v19 = vpop.f32.mrf.mxu0 }
 0x155   : > { %v1347_v44 = vadd.f32 %v1303_v57, %v1252_v56 }
 0x157   : > { %v2648_v26 = vadd.f32 %v2625_v50, %v1347_v44 }
 0x158   : > { %v1115_v55 = vpop.f32.mrf.mxu2  ;;  %v1211_v20 = vpop.f32.mrf.mxu3 }
 0x159   : > { %1384 = vst.msk [vmem:[%s2630_s27 + $0x10] sm:$0xff] %vm1381_vm4, %v2648_v26  ;;  %v1157_v24 = vadd.f32 %v1115_v55, %v1065_v35  ;;  %v1026_v4 = vpop.f32.mrf.mxu1 }
 0x15a   : > { %v1066_v60 = vadd.f32 %v1026_v4, %v2495_v28 }
 0x15b   : > { %v1253_v63 = vadd.f32 %v1211_v20, %v1157_v24 }
 0x15c   : > { %v1309_v27 = vpop.f32.mrf.mxu0 }
 0x15d   : > { %v1348_v54 = vadd.f32 %v1306_v19, %v1253_v63 }
 0x15f   : > { %v2655_v13 = vadd.f32 %v2625_v50, %v1348_v54 }
 0x160   : > { %v1118_v2 = vpop.f32.mrf.mxu2  ;;  %v1214_v38 = vpop.f32.mrf.mxu3 }
 0x161   : > { %1385 = vst.msk [vmem:[%s2630_s27 + $0x18] sm:$0xff] %vm1381_vm4, %v2655_v13  ;;  %v1158_v30 = vadd.f32 %v1118_v2, %v1066_v60  ;;  %v1029_v17 = vpop.f32.mrf.mxu1  ;;  %v1398_v2 = vsel %vm1381_vm4, %v2634_v39, 0.0 }
 0x162   : > { %v1067_v59 = vadd.f32 %v1029_v17, %v2506_v21  ;;  %v1403_v17 = vsel %vm1381_vm4, %v2655_v13, 0.0 }
 0x163   : > { %v1254_v7 = vadd.f32 %v1214_v38, %v1158_v30 }
 0x164   : > { %v1312_v23 = vpop.f32.mrf.mxu0 }
 0x165   : > { %v1349_v42 = vadd.f32 %v1309_v27, %v1254_v7  ;;  %v1399_v27 = vsel %vm1381_vm4, %v2641_v61, 0.0 }
 0x166   : > { %v1400_v30 = vadd.f32 %v1399_v27, %v1398_v2 }
 0x167   : > { %v2662_v52 = vadd.f32 %v2625_v50, %v1349_v42 }
 0x168   : > { %v1121_v28 = vpop.f32.mrf.mxu2  ;;  %v1217_v6 = vpop.f32.mrf.mxu3 }
 0x169   : > { %1386 = vst.msk [vmem:[%s2630_s27 + $0x20] sm:$0xff] %vm1381_vm4, %v2662_v52  ;;  %v1159_v16 = vadd.f32 %v1121_v28, %v1067_v59  ;;  %v1032_v33 = vpop.f32.mrf.mxu1 }
 0x16a   : > { %v1068_v10 = vadd.f32 %v1032_v33, %v2517_v34 }
 0x16b   : > { %v1255_v22 = vadd.f32 %v1217_v6, %v1159_v16  ;;  %v1405_v6 = vsel %vm1381_vm4, %v2662_v52, 0.0 }
 0x16c   : > { %v1315_v48 = vpop.f32.mrf.mxu0 }
 0x16d   : > { %v1350_v11 = vadd.f32 %v1312_v23, %v1255_v22 }
 0x16f   : > { %v2669_v37 = vadd.f32 %v2625_v50, %v1350_v11 }
 0x170   : > { %v1124_v21 = vpop.f32.mrf.mxu2  ;;  %v1220_v15 = vpop.f32.mrf.mxu3 }
 0x171   : > { %1387 = vst.msk [vmem:[%s2630_s27 + $0x28] sm:$0xff] %vm1381_vm4, %v2669_v37  ;;  %v1160_v31 = vadd.f32 %v1124_v21, %v1068_v10  ;;  %v1035_v45 = vpop.f32.mrf.mxu1 }
 0x172   : > { %v1069_v29 = vadd.f32 %v1035_v45, %v2528_v5 }
 0x173   : > { %v1256_v36 = vadd.f32 %v1220_v15, %v1160_v31 }
 0x174   : > { %v1318_v51 = vpop.f32.mrf.mxu0 }
 0x175   : > { %v1351_v62 = vadd.f32 %v1315_v48, %v1256_v36  ;;  %v1407_v48 = vsel %vm1381_vm4, %v2669_v37, 0.0 }
 0x177   : > { %v2676_v58 = vadd.f32 %v2625_v50, %v1351_v62 }
 0x178   : > { %v1127_v34 = vpop.f32.mrf.mxu2  ;;  %v1223_v14 = vpop.f32.mrf.mxu3 }
 0x179   : > { %1388 = vst.msk [vmem:[%s2630_s27 + $0x30] sm:$0xff] %vm1381_vm4, %v2676_v58  ;;  %v1161_v49 = vadd.f32 %v1127_v34, %v1069_v29  ;;  %v1038_v41 = vpop.f32.mrf.mxu1  ;;  %v1409_v21 = vsel %vm1381_vm4, %v2676_v58, 0.0 }
 0x17a   : > { %v1070_v25 = vadd.f32 %v1038_v41, %v2539_v8 }
 0x17b   : > { %v1257_v57 = vadd.f32 %v1223_v14, %v1161_v49 }
 0x17c   : > { %v1321_v46 = vpop.f32.mrf.mxu0 }
 0x17d   : > { %v1352_v18 = vadd.f32 %v1318_v51, %v1257_v57 }
 0x17f   : > { %v2683_v53 = vadd.f32 %v2625_v50, %v1352_v18 }
 0x180   : > { %v1130_v5 = vpop.f32.mrf.mxu2  ;;  %v1226_v40 = vpop.f32.mrf.mxu3 }
 0x181   : > { %1389 = vst.msk [vmem:[%s2630_s27 + $0x38] sm:$0xff] %vm1381_vm4, %v2683_v53  ;;  %v1162_v9 = vadd.f32 %v1130_v5, %v1070_v25  ;;  %v1041_v56 = vpop.f32.mrf.mxu1  ;;  %v1411_v45 = vsel %vm1381_vm4, %v2683_v53, 0.0 }
 0x182   : > { %v1071_v55 = vadd.f32 %v1041_v56, %v2550_v32  ;;  %v1401_v32 = vsel %vm1381_vm4, %v2648_v26, 0.0 }
 0x183   : > { %v1258_v19 = vadd.f32 %v1226_v40, %v1162_v9  ;;  %v1402_v42 = vadd.f32 %v1401_v32, %v1400_v30 }
 0x184   : > { %v1324_v44 = vpop.f32.mrf.mxu0 }
 0x185   : > { %v1353_v35 = vadd.f32 %v1321_v46, %v1258_v19  ;;  %v1404_v22 = vadd.f32 %v1403_v17, %v1402_v42 }
 0x187   : > { %v2690_v20 = vadd.f32 %v2625_v50, %v1353_v35  ;;  %v1406_v11 = vadd.f32 %v1405_v6, %v1404_v22 }
 0x188   : > { %v1133_v24 = vpop.f32.mrf.mxu2  ;;  %v1229_v8 = vpop.f32.mrf.mxu3 }
 0x189   : > { %1390 = vst.msk [vmem:[%s2630_s27 + $0x40] sm:$0xff] %vm1381_vm4, %v2690_v20  ;;  %v1163_v4 = vadd.f32 %v1133_v24, %v1071_v55  ;;  %v1044_v63 = vpop.f32.mrf.mxu1  ;;  %v1408_v31 = vadd.f32 %v1407_v48, %v1406_v11  ;;  %v1413_v14 = vsel %vm1381_vm4, %v2690_v20, 0.0 }
 0x18a   : > { %v1072_v7 = vadd.f32 %v1044_v63, %v2561_v0 }
 0x18b   : > { %v1259_v54 = vadd.f32 %v1229_v8, %v1163_v4  ;;  %v1410_v62 = vadd.f32 %v1409_v21, %v1408_v31 }
 0x18c   : > { %v1327_v60 = vpop.f32.mrf.mxu0 }
 0x18d   : > { %v1354_v38 = vadd.f32 %v1324_v44, %v1259_v54  ;;  %v1412_v57 = vadd.f32 %v1411_v45, %v1410_v62 }
 0x18f   : > { %v2705_v23 = vadd.f32 %v2625_v50, %v1354_v38  ;;  %v1414_v18 = vadd.f32 %v1413_v14, %v1412_v57 }
 0x190   : > { %v1136_v59 = vpop.f32.mrf.mxu2  ;;  %v1232_v28 = vpop.f32.mrf.mxu3 }
 0x191   : > { %1391 = vst.msk [vmem:[%s2630_s27 + $0x48] sm:$0xff] %vm1381_vm4, %v2705_v23  ;;  %v1164_v16 = vadd.f32 %v1136_v59, %v1072_v7  ;;  %v1047_v33 = vpop.f32.mrf.mxu1  ;;  %v1415_v46 = vsel %vm1381_vm4, %v2705_v23, 0.0 }
 0x192   : > { %v1073_v36 = vadd.f32 %v1047_v33, %v2575_v3  ;;  %v1416_v9 = vadd.f32 %v1415_v46, %v1414_v18 }
 0x193   : > { %v1260_v0 = vadd.f32 %v1232_v28, %v1164_v16 }
 0x194   : > { %v1330_v10 = vpop.f32.mrf.mxu0 }
 0x195   : > { %v1355_v15 = vadd.f32 %v1327_v60, %v1260_v0 }
 0x197   : > { %v2720_v51 = vadd.f32 %v2625_v50, %v1355_v15 }
 0x198   : > { %v1139_v29 = vpop.f32.mrf.mxu2  ;;  %v1235_v34 = vpop.f32.mrf.mxu3 }
 0x199   : > { %1392 = vst.msk [vmem:[%s2630_s27 + $0x50] sm:$0xff] %vm1381_vm4, %v2720_v51  ;;  %v1165_v49 = vadd.f32 %v1139_v29, %v1073_v36  ;;  %v1050_v41 = vpop.f32.mrf.mxu1  ;;  %v1417_v5 = vsel %vm1381_vm4, %v2720_v51, 0.0 }
 0x19a   : > { %v1074_v56 = vadd.f32 %v1050_v41, %v2589_v47  ;;  %v1418_v44 = vadd.f32 %v1417_v5, %v1416_v9 }
 0x19b   : > { %v1261_v3 = vadd.f32 %v1235_v34, %v1165_v49 }
 0x19c   : > { %v1333_v25 = vpop.f32.mrf.mxu0 }
 0x19d   : > { %v1356_v40 = vadd.f32 %v1330_v10, %v1261_v3 }
 0x19f   : > { %v2733_v19 = vadd.f32 %v2625_v50, %v1356_v40 }
 0x1a0   : > { %v1142_v35 = vpop.f32.mrf.mxu2  ;;  %v1238_v55 = vpop.f32.mrf.mxu3 }
 0x1a1   : > { %1393 = vst.msk [vmem:[%s2630_s27 + $0x58] sm:$0xff] %vm1381_vm4, %v2733_v19  ;;  %v1419_v24 = vsel %vm1381_vm4, %v2733_v19, 0.0  ;;  %v1166_v8 = vadd.f32 %v1142_v35, %v1074_v56  ;;  %v1053_v4 = vpop.f32.mrf.mxu1 }
 0x1a2   : > { %v1420_v63 = vadd.f32 %v1419_v24, %v1418_v44  ;;  %v1075_v47 = vadd.f32 %v1053_v4, %v2601_v12 }
 0x1a3   : > { %v1262_v27 = vadd.f32 %v1238_v55, %v1166_v8 }
 0x1a4   : > { %v1336_v60 = vpop.f32.mrf.mxu0 }
 0x1a5   : > { %v1357_v54 = vadd.f32 %v1333_v25, %v1262_v27 }
 0x1a7   : > { %v1377_v2 = vadd.f32 %v2625_v50, %v1357_v54 }
 0x1a8   : > { %v1145_v32 = vpop.f32.mrf.mxu2  ;;  %v1241_v38 = vpop.f32.mrf.mxu3 }
 0x1a9   : > { %1394 = vst.msk [vmem:[%s2630_s27 + $0x60] sm:$0xff] %vm1381_vm4, %v1377_v2  ;;  %v1421_v30 = vsel %vm1381_vm4, %v1377_v2, 0.0  ;;  %v1167_v17 = vadd.f32 %v1145_v32, %v1075_v47  ;;  %v1056_v42 = vpop.f32.mrf.mxu1 }
 0x1aa   : > { %v1422_v7 = vadd.f32 %v1421_v30, %v1420_v63  ;;  %v1076_v6 = vadd.f32 %v1056_v42, %v2610_v1 }
 0x1ab   : > { %v1263_v59 = vadd.f32 %v1241_v38, %v1167_v17 }
 0x1ac   : > { %v1339_v12 = vpop.f32.mrf.mxu0 }
 0x1ad   : > { %v1358_v28 = vadd.f32 %v1336_v60, %v1263_v59 }
 0x1af   : > { %v1378_v16 = vadd.f32 %v2625_v50, %v1358_v28 }
 0x1b0   : > { %v1148_v33 = vpop.f32.mrf.mxu2  ;;  %v1244_v22 = vpop.f32.mrf.mxu3 }
 0x1b1   : > { %1395 = vst.msk [vmem:[%s2630_s27 + $0x68] sm:$0xff] %vm1381_vm4, %v1378_v16  ;;  %v1423_v48 = vsel %vm1381_vm4, %v1378_v16, 0.0  ;;  %v1168_v0 = vadd.f32 %v1148_v33, %v1076_v6  ;;  %v1059_v21 = vpop.f32.mrf.mxu1 }
 0x1b2   : > { %v1424_v11 = vadd.f32 %v1423_v48, %v1422_v7  ;;  %v1077_v1 = vadd.f32 %v1059_v21, %v2618_v43 }
 0x1b3   : > { %v1264_v10 = vadd.f32 %v1244_v22, %v1168_v0 }
 0x1b4   : > { %v1342_v14 = vpop.f32.mrf.mxu0 }
 0x1b5   : > { %v1359_v15 = vadd.f32 %v1339_v12, %v1264_v10 }
 0x1b7   : > { %v1379_v31 = vadd.f32 %v2625_v50, %v1359_v15 }
 0x1b8   : > { %v1151_v45 = vpop.f32.mrf.mxu2  ;;  %v1247_v36 = vpop.f32.mrf.mxu3 }
 0x1b9   : > { %1396 = vst.msk [vmem:[%s2630_s27 + $0x70] sm:$0xff] %vm1381_vm4, %v1379_v31  ;;  %v1425_v62 = vsel %vm1381_vm4, %v1379_v31, 0.0  ;;  %v1169_v29 = vadd.f32 %v1151_v45, %v1077_v1 }
 0x1ba   : > { %v1426_v34 = vadd.f32 %v1425_v62, %v1424_v11 }
 0x1bb   : > { %v1265_v49 = vadd.f32 %v1247_v36, %v1169_v29 }
 0x1bd   : > { %v1360_v41 = vadd.f32 %v1342_v14, %v1265_v49 }
 0x1bf   : > { %v1380_v57 = vadd.f32 %v2625_v50, %v1360_v41 }
 0x1c1   : > { %1397 = vst.msk [vmem:[%s2630_s27 + $0x78] sm:$0xff] %vm1381_vm4, %v1380_v57  ;;  %v1427_v43 = vsel %vm1381_vm4, %v1380_v57, 0.0 }
 0x1c2   : > { %v1428_v46 = vadd.f32 %v1427_v43, %v1426_v34 }
 0x1c4   : > { %v1429_v3 = vrot.slane %v1428_v46, 4 }
 0x1c6   : > { %v1430_v18 = vadd.f32 %v1429_v3, %v1428_v46 }
 0x1c8   : > { %v1431_v25 = vrot.slane %v1430_v18, 2 }
 0x1ca   : > { %v1432_v5 = vadd.f32 %v1431_v25, %v1430_v18 }
 0x1cc   : > { %v1433_v40 = vrot.slane %v1432_v5, 1 }
 0x1ce   : > { %v1434_v50 = vadd.f32 %v1433_v40, %v1432_v5 }
 0x1d0   : > { %v1435_v9 = vmul.f32 0.0078125, %v1434_v50  ;;  %1506 = vst.msk [vmem:[%s2764_s19] sm:$0x1] %vm1505_vm5, %v1434_v50 }
 0x1d2   : > { %v1436_v56 = vsub.f32 %v2634_v39, %v1435_v9  ;;  %v1437_v44 = vsub.f32 %v2641_v61, %v1435_v9  ;;  %v1438_v35 = vsub.f32 %v2648_v26, %v1435_v9  ;;  %v1446_v55 = vsub.f32 %v2720_v51, %v1435_v9 }
 0x1d3   : > { %v1447_v24 = vsub.f32 %v2733_v19, %v1435_v9  ;;  %v1448_v8 = vsub.f32 %v1377_v2, %v1435_v9  ;;  %v1449_v4 = vsub.f32 %v1378_v16, %v1435_v9  ;;  %v1450_v63 = vsub.f32 %v1379_v31, %v1435_v9 }
 0x1d4   : > { %v1451_v27 = vsub.f32 %v1380_v57, %v1435_v9  ;;  %v1439_v54 = vsub.f32 %v2655_v13, %v1435_v9  ;;  %v1452_v60 = vmul.f32 %v1436_v56, %v1436_v56  ;;  %v1453_v47 = vmul.f32 %v1437_v44, %v1437_v44 }
 0x1d5   : > { %v1440_v32 = vsub.f32 %v2662_v52, %v1435_v9  ;;  %v1454_v38 = vmul.f32 %v1438_v35, %v1438_v35  ;;  %v1441_v39 = vsub.f32 %v2669_v37, %v1435_v9  ;;  %v1442_v19 = vsub.f32 %v2676_v58, %v1435_v9 }
 0x1d6   : > { %v1455_v61 = vmul.f32 %v1439_v54, %v1439_v54  ;;  %v1468_v26 = vsel %vm1381_vm4, %v1452_v60, 0.0  ;;  %v1469_v51 = vsel %vm1381_vm4, %v1453_v47, 0.0  ;;  %v1443_v13 = vsub.f32 %v2683_v53, %v1435_v9 }
 0x1d7   : > { %v1470_v30 = vadd.f32 %v1469_v51, %v1468_v26  ;;  %v1456_v2 = vmul.f32 %v1440_v32, %v1440_v32  ;;  %v1471_v17 = vsel %vm1381_vm4, %v1454_v38, 0.0  ;;  %v1457_v42 = vmul.f32 %v1441_v39, %v1441_v39 }
 0x1d8   : > { %v1473_v52 = vsel %vm1381_vm4, %v1455_v61, 0.0  ;;  %v1444_v37 = vsub.f32 %v2690_v20, %v1435_v9  ;;  %v1458_v28 = vmul.f32 %v1442_v19, %v1442_v19  ;;  %v1445_v12 = vsub.f32 %v2705_v23, %v1435_v9 }
 0x1d9   : > { %v1472_v7 = vadd.f32 %v1471_v17, %v1470_v30  ;;  %v1475_v6 = vsel %vm1381_vm4, %v1456_v2, 0.0  ;;  %v1459_v33 = vmul.f32 %v1443_v13, %v1443_v13  ;;  %v1477_v58 = vsel %vm1381_vm4, %v1457_v42, 0.0 }
 0x1da   : > { %v1460_v48 = vmul.f32 %v1444_v37, %v1444_v37  ;;  %v1479_v0 = vsel %vm1381_vm4, %v1458_v28, 0.0  ;;  %v1461_v11 = vmul.f32 %v1445_v12, %v1445_v12  ;;  %v1462_v15 = vmul.f32 %v1446_v55, %v1446_v55 }
 0x1db   : > { %v1474_v59 = vadd.f32 %v1473_v52, %v1472_v7  ;;  %v1481_v10 = vsel %vm1381_vm4, %v1459_v33, 0.0  ;;  %v1463_v31 = vmul.f32 %v1447_v24, %v1447_v24  ;;  %v1464_v36 = vmul.f32 %v1448_v8, %v1448_v8 }
 0x1dc   : > { %v1483_v20 = vsel %vm1381_vm4, %v1460_v48, 0.0  ;;  %v1485_v45 = vsel %vm1381_vm4, %v1461_v11, 0.0  ;;  %v1487_v62 = vsel %vm1381_vm4, %v1462_v15, 0.0  ;;  %v1465_v34 = vmul.f32 %v1449_v4, %v1449_v4 }
 0x1dd   : > { %v1476_v16 = vadd.f32 %v1475_v6, %v1474_v59  ;;  %v1489_v14 = vsel %vm1381_vm4, %v1463_v31, 0.0  ;;  %v1466_v41 = vmul.f32 %v1450_v63, %v1450_v63  ;;  %v1491_v57 = vsel %vm1381_vm4, %v1464_v36, 0.0 }
 0x1de   : > { %v1467_v46 = vmul.f32 %v1451_v27, %v1451_v27  ;;  %v1493_v3 = vsel %vm1381_vm4, %v1465_v34, 0.0 }
 0x1df   : > { %v1478_v22 = vadd.f32 %v1477_v58, %v1476_v16  ;;  %v1495_v25 = vsel %vm1381_vm4, %v1466_v41, 0.0 }
 0x1e0   : > { %v1497_v40 = vsel %vm1381_vm4, %v1467_v46, 0.0 }
 0x1e1   : > { %v1480_v53 = vadd.f32 %v1479_v0, %v1478_v22 }
 0x1e3   : > { %v1482_v21 = vadd.f32 %v1481_v10, %v1480_v53 }
 0x1e5   : > { %v1484_v1 = vadd.f32 %v1483_v20, %v1482_v21 }
 0x1e7   : > { %v1486_v23 = vadd.f32 %v1485_v45, %v1484_v1 }
 0x1e9   : > { %v1488_v29 = vadd.f32 %v1487_v62, %v1486_v23 }
 0x1eb   : > { %v1490_v49 = vadd.f32 %v1489_v14, %v1488_v29 }
 0x1ed   : > { %v1492_v43 = vadd.f32 %v1491_v57, %v1490_v49 }
 0x1ef   : > { %v1494_v18 = vadd.f32 %v1493_v3, %v1492_v43 }
 0x1f1   : > { %v1496_v5 = vadd.f32 %v1495_v25, %v1494_v18 }
 0x1f3   : > { %v1498_v50 = vadd.f32 %v1497_v40, %v1496_v5 }
 0x1f5   : > { %v1499_v9 = vrot.slane %v1498_v50, 4 }
 0x1f7   : > { %v1500_v56 = vadd.f32 %v1499_v9, %v1498_v50 }
 0x1f9   : > { %v1501_v44 = vrot.slane %v1500_v56, 2 }
 0x1fb   : > { %v1502_v35 = vadd.f32 %v1501_v44, %v1500_v56 }
 0x1fd   : > { %v1503_v55 = vrot.slane %v1502_v35, 1 }
 0x1ff   : > { %v1504_v24 = vadd.f32 %v1503_v55, %v1502_v35 }
 0x201   : > { %1507 = vst.msk [vmem:[%s2764_s19 + $0x1] sm:$0x1] %vm1505_vm5, %v1504_v24 }
 0x202 PF: > { %s16_s22 = sadd.s32 1, %s1932_s22   ;;  %s2828_s18 = smov %s1924_s20 }
 0x203   : > { %p13_p10 = scmp.ge.s32.totalorder %s16_s22, 6   ;;  %s2829_s19 = smov %s1928_s21 }
 0x204   : > { %s2830_s20 = smov %s2833_s23  ;;  %s2831_s21 = smov %s2837_s24 }
 0x205   :  { %15 = sbr.rel (!%p13_p10) target bundleno = 3 (0x3), region = 89 }

</bundles_post_ra>
